<compile_context>
chip_gen: v7x
topology: tpu7x:2x2x1
jax: 0.10.0
libtpu: 0.0.40
codegen_flags: <defaults>
</compile_context>

<pallas_src>
import functools

import jax
import jax.numpy as jnp
from jax.experimental import pallas as pl
from jax.experimental.pallas import tpu as pltpu


def _ensemble_fused_kernel(x_ref, w1_ref, b1_ref, wh_ref, bh_ref, out_ref):
    # x_ref  : (n_cams, K)                   bf16  flattened image+geo (shared)
    # w1_ref : (K, n_models*hidden)          bf16  layer-1 weights, members along N
    # b1_ref : (1, n_models*hidden)          f32
    # wh_ref : (hidden, n_models*out_dim)    bf16  head weights, members along N
    # bh_ref : (n_models, out_dim)           f32
    # out_ref: (n_models, out_dim)           f32
    n_models, out_dim = out_ref.shape
    hidden = wh_ref.shape[0]

    # Layer 1 for all ensemble members in one MXU matmul (f32 accumulate).
    feat = jnp.dot(x_ref[...], w1_ref[...], preferred_element_type=jnp.float32)
    feat = jnp.maximum(feat + b1_ref[...], 0.0)          # (n_cams, n_models*hidden) f32

    # Pool over cameras (sublane reduce, XLU).
    pooled = jnp.sum(feat, axis=0, keepdims=True)        # (1, n_models*hidden) f32

    # Head: n_models lane-aligned partial dots (hidden and out_dim are multiples
    # of 128, so all slices are lane-aligned); single sublane concat of the
    # (1, out_dim) rows. O(n_models) MXU work, no wasted columns, no repack.
    rows = []
    for m in range(n_models):
        pm = pooled[:, m * hidden:(m + 1) * hidden].astype(wh_ref.dtype)   # (1, hidden)
        wm = wh_ref[:, m * out_dim:(m + 1) * out_dim]                       # (hidden, out_dim)
        rows.append(jnp.dot(pm, wm, preferred_element_type=jnp.float32))
    logits = jnp.concatenate(rows, axis=0)               # (n_models, out_dim) f32

    out_ref[...] = (logits + bh_ref[...]).astype(out_ref.dtype)   # lane-dense store


def prepare_ensemble_params(params):
    """ONE-TIME parameter prep (run once, reuse across forwards).

    Fuses ensemble members along the output axis of each layer, folds the
    geometry features into the layer-1 contraction axis, pre-transposes to the
    (K, N) layout the kernel consumes, and casts weights to bf16 / biases to f32.
    """
    wimg, wgeo, b, whead, bhead = params
    n_models, d_img, hidden = wimg.shape
    d_geo = wgeo.shape[1]
    out_dim = whead.shape[-1]

    w1_all = jnp.concatenate([wimg, wgeo], axis=1)                       # (M, K, H)
    w1_all = jnp.transpose(w1_all, (1, 0, 2)).reshape(d_img + d_geo, n_models * hidden)
    w1_all = w1_all.astype(jnp.bfloat16)
    b1_all = b.reshape(1, n_models * hidden).astype(jnp.float32)

    wh_all = jnp.transpose(whead, (1, 0, 2)).reshape(hidden, n_models * out_dim)
    wh_all = wh_all.astype(jnp.bfloat16)
    bh_all = bhead.reshape(n_models, out_dim).astype(jnp.float32)

    return (w1_all, b1_all, wh_all, bh_all)


@functools.partial(jax.jit, static_argnames=("n_classes", "h_bev", "w_bev"))
def model_package_forward(images, intrinsics, extrinsics, prepared,
                          *, n_classes, h_bev, w_bev):
    """images: (B, N_cams, C, H, W); intrinsics: (B, N_cams, 3, 3);
    extrinsics: (B, N_cams, 4, 4). Only batch element 0 is used, matching the
    PyTorch forward. `prepared` comes from prepare_ensemble_params.
    Returns (n_models, n_classes, h_bev, w_bev)."""
    w1_all, b1_all, wh_all, bh_all = prepared
    k_dim = w1_all.shape[0]
    hidden = wh_all.shape[0]
    n_models, out_dim = bh_all.shape
    assert out_dim == n_classes * h_bev * w_bev

    # --- cheap per-call glue: flatten batch element 0, fuse geo into K --------
    img0 = images[0]                                        # (N_cams, C, H, W)
    n_cams = img0.shape[0]
    img_flat = img0.reshape(n_cams, -1)                     # (N_cams, D_IMG)
    d_img = img_flat.shape[1]
    d_geo = k_dim - d_img

    geo_raw = jnp.concatenate(
        [intrinsics[0].reshape(n_cams, -1),
         extrinsics[0].reshape(n_cams, -1)], axis=-1)       # (N_cams, 25)
    geo_flat = jnp.pad(geo_raw, ((0, 0), (0, d_geo - geo_raw.shape[1])))

    x = jnp.concatenate([img_flat, geo_flat], axis=-1).astype(jnp.bfloat16)

    # --- single Pallas call (no grid): body is a few hundred ns, DMA-bound ----
    flops = 2 * n_cams * k_dim * n_models * hidden + 2 * n_models * hidden * out_dim
    bytes_accessed = (x.size * 2 + w1_all.size * 2 + wh_all.size * 2
                      + b1_all.size * 4 + bh_all.size * 4 + n_models * out_dim * 4)

    vmem = pl.BlockSpec(memory_space=pltpu.MemorySpace.VMEM)
    out = pl.pallas_call(
        _ensemble_fused_kernel,
        out_shape=jax.ShapeDtypeStruct((n_models, out_dim), jnp.float32),
        in_specs=[vmem, vmem, vmem, vmem, vmem],
        out_specs=vmem,
        cost_estimate=pl.CostEstimate(flops=flops, transcendentals=0,
                                      bytes_accessed=bytes_accessed),
    )(x, w1_all, b1_all, wh_all, bh_all)

    # torch.stack(out) equivalent: (n_models, n_classes, h_bev, w_bev)
    return out.reshape(n_models, n_classes, h_bev, w_bev)


def _reference_forward(images, intrinsics, extrinsics, params,
                       *, n_classes, h_bev, w_bev):
    """Pure-f32 per-member reference mirroring the PyTorch module structure."""
    wimg, wgeo, b, whead, bhead = params
    n_models = wimg.shape[0]
    d_geo = wgeo.shape[1]
    img0 = images[0]
    n_cams = img0.shape[0]
    img_flat = img0.reshape(n_cams, -1).astype(jnp.float32)
    geo_raw = jnp.concatenate(
        [intrinsics[0].reshape(n_cams, -1),
         extrinsics[0].reshape(n_cams, -1)], axis=-1).astype(jnp.float32)
    geo_flat = jnp.pad(geo_raw, ((0, 0), (0, d_geo - geo_raw.shape[1])))
    outs = []
    for m in range(n_models):
        feat = img_flat @ wimg[m] + geo_flat @ wgeo[m] + b[m]
        feat = jnp.maximum(feat, 0.0)
        pooled = jnp.sum(feat, axis=0, keepdims=True)
        logits = pooled @ whead[m] + bhead[m]
        outs.append(logits.reshape(n_classes, h_bev, w_bev))
    return jnp.stack(outs)


if __name__ == "__main__":
    # small shapes consistent with the forward signature
    B, N_CAMS, C, H, W = 2, 4, 3, 16, 16
    N_MODELS, N_CLASSES = 3, 4
    HIDDEN = 128
    H_BEV, W_BEV = 8, 8
    D_IMG = C * H * W                       # 768
    D_GEO = 32                              # 9 + 16 = 25 real geo features, padded to 32
    OUT_DIM = N_CLASSES * H_BEV * W_BEV     # 256

    key = jax.random.PRNGKey(0)
    k = jax.random.split(key, 8)

    images = jax.random.normal(k[0], (B, N_CAMS, C, H, W), jnp.float32)
    intrinsics = jax.random.normal(k[1], (B, N_CAMS, 3, 3), jnp.float32)
    extrinsics = jax.random.normal(k[2], (B, N_CAMS, 4, 4), jnp.float32)

    # deterministic per-member parameters (synthetic init, no checkpoint load)
    wimg = jax.random.normal(k[3], (N_MODELS, D_IMG, HIDDEN), jnp.float32) * 0.02
    wgeo = jax.random.normal(k[4], (N_MODELS, D_GEO, HIDDEN), jnp.float32) * 0.02
    b = jax.random.normal(k[5], (N_MODELS, 1, HIDDEN), jnp.float32) * 0.01
    whead = jax.random.normal(k[6], (N_MODELS, HIDDEN, OUT_DIM), jnp.float32) * 0.02
    bhead = jax.random.normal(k[7], (N_MODELS, 1, OUT_DIM), jnp.float32) * 0.01
    params = (wimg, wgeo, b, whead, bhead)

    # one-time weight prep (hoisted out of the per-call path)
    prepared = jax.block_until_ready(prepare_ensemble_params(params))

    out = model_package_forward(images, intrinsics, extrinsics, prepared,
                                n_classes=N_CLASSES, h_bev=H_BEV, w_bev=W_BEV)
    out = jax.block_until_ready(out)
    assert out.shape == (N_MODELS, N_CLASSES, H_BEV, W_BEV), out.shape

    ref = _reference_forward(images, intrinsics, extrinsics, params,
                             n_classes=N_CLASSES, h_bev=H_BEV, w_bev=W_BEV)
    # Kernel uses bf16 MXU operands with f32 accumulation; compare against the
    # f32 reference with bf16-level tolerance.
    max_err = float(jnp.max(jnp.abs(out - ref)))
    assert jnp.allclose(out, ref, atol=2e-2, rtol=2e-2), max_err

    print("KERNEL_OK")
</pallas_src>

<mosaic_0001>
module attributes {stable_mosaic.version = 11 : i64} {
  func.func @_ensemble_fused_kernel(%arg0: memref<4x800xbf16, #tpu.memory_space<vmem>>, %arg1: memref<800x384xbf16, #tpu.memory_space<vmem>>, %arg2: memref<1x384xf32, #tpu.memory_space<vmem>>, %arg3: memref<128x768xbf16, #tpu.memory_space<vmem>>, %arg4: memref<3x256xf32, #tpu.memory_space<vmem>>, %arg5: memref<3x256xf32, #tpu.memory_space<vmem>>) attributes {dimension_semantics = [], scalar_prefetch = 0 : i64, scratch_operands = 0 : i64, tpu.core_type = #tpu.core_type<tc>} {
    %c0 = arith.constant 0 : index
    %c0_0 = arith.constant 0 : index
    %0 = vector.load %arg0[%c0, %c0_0] : memref<4x800xbf16, #tpu.memory_space<vmem>>, vector<4x800xbf16>
    %c0_1 = arith.constant 0 : index
    %c0_2 = arith.constant 0 : index
    %1 = vector.load %arg1[%c0_1, %c0_2] : memref<800x384xbf16, #tpu.memory_space<vmem>>, vector<800x384xbf16>
    %cst = arith.constant dense<0.000000e+00> : vector<4x384xf32>
    %2 = tpu.matmul %0, %1, %cst {dimension_numbers = #tpu.dot_dimension_numbers<[1], [0], [0], [1], [0, 0, 1, 1], [], []>} : vector<4x800xbf16>, vector<800x384xbf16>, vector<4x384xf32> -> vector<4x384xf32>
    %c0_3 = arith.constant 0 : index
    %c0_4 = arith.constant 0 : index
    %3 = vector.load %arg2[%c0_3, %c0_4] : memref<1x384xf32, #tpu.memory_space<vmem>>, vector<1x384xf32>
    %4 = vector.broadcast %3 : vector<1x384xf32> to vector<4x384xf32>
    %5 = arith.addf %2, %4 : vector<4x384xf32>
    %cst_5 = arith.constant 0.000000e+00 : f32
    %6 = vector.broadcast %cst_5 : f32 to vector<4x384xf32>
    %7 = arith.maximumf %5, %6 : vector<4x384xf32>
    %cst_6 = arith.constant dense<0.000000e+00> : vector<384xf32>
    %8 = vector.multi_reduction <add>, %7, %cst_6 [0] : vector<4x384xf32> to vector<384xf32>
    %9 = vector.shape_cast %8 : vector<384xf32> to vector<1x384xf32>
    %10 = vector.extract_strided_slice %9 {offsets = [0, 0], sizes = [1, 128], strides = [1, 1]} : vector<1x384xf32> to vector<1x128xf32>
    %11 = arith.truncf %10 : vector<1x128xf32> to vector<1x128xbf16>
    %c0_7 = arith.constant 0 : index
    %c0_8 = arith.constant 0 : index
    %12 = vector.load %arg3[%c0_7, %c0_8] : memref<128x768xbf16, #tpu.memory_space<vmem>>, vector<128x256xbf16>
    %cst_9 = arith.constant dense<0.000000e+00> : vector<1x256xf32>
    %13 = tpu.matmul %11, %12, %cst_9 {dimension_numbers = #tpu.dot_dimension_numbers<[1], [0], [0], [1], [0, 0, 1, 1], [], []>} : vector<1x128xbf16>, vector<128x256xbf16>, vector<1x256xf32> -> vector<1x256xf32>
    %14 = vector.extract_strided_slice %9 {offsets = [0, 128], sizes = [1, 128], strides = [1, 1]} : vector<1x384xf32> to vector<1x128xf32>
    %15 = arith.truncf %14 : vector<1x128xf32> to vector<1x128xbf16>
    %c0_10 = arith.constant 0 : index
    %c256 = arith.constant 256 : index
    %16 = vector.load %arg3[%c0_10, %c256] : memref<128x768xbf16, #tpu.memory_space<vmem>>, vector<128x256xbf16>
    %cst_11 = arith.constant dense<0.000000e+00> : vector<1x256xf32>
    %17 = tpu.matmul %15, %16, %cst_11 {dimension_numbers = #tpu.dot_dimension_numbers<[1], [0], [0], [1], [0, 0, 1, 1], [], []>} : vector<1x128xbf16>, vector<128x256xbf16>, vector<1x256xf32> -> vector<1x256xf32>
    %18 = vector.extract_strided_slice %9 {offsets = [0, 256], sizes = [1, 128], strides = [1, 1]} : vector<1x384xf32> to vector<1x128xf32>
    %19 = arith.truncf %18 : vector<1x128xf32> to vector<1x128xbf16>
    %c0_12 = arith.constant 0 : index
    %c512 = arith.constant 512 : index
    %20 = vector.load %arg3[%c0_12, %c512] : memref<128x768xbf16, #tpu.memory_space<vmem>>, vector<128x256xbf16>
    %cst_13 = arith.constant dense<0.000000e+00> : vector<1x256xf32>
    %21 = tpu.matmul %19, %20, %cst_13 {dimension_numbers = #tpu.dot_dimension_numbers<[1], [0], [0], [1], [0, 0, 1, 1], [], []>} : vector<1x128xbf16>, vector<128x256xbf16>, vector<1x256xf32> -> vector<1x256xf32>
    %22 = tpu.concatenate %13, %17, %21 in 0 : vector<1x256xf32>, vector<1x256xf32>, vector<1x256xf32> -> vector<3x256xf32>
    %c0_14 = arith.constant 0 : index
    %c0_15 = arith.constant 0 : index
    %23 = vector.load %arg4[%c0_14, %c0_15] : memref<3x256xf32, #tpu.memory_space<vmem>>, vector<3x256xf32>
    %24 = arith.addf %22, %23 : vector<3x256xf32>
    %c0_16 = arith.constant 0 : index
    %c0_17 = arith.constant 0 : index
    %25 = vector.load %arg5[%c0_16, %c0_17] : memref<3x256xf32, #tpu.memory_space<vmem>>, vector<3x256xf32>
    tpu.vector_store %arg5[%c0_16, %c0_17], %24 {strides = array<i32>} : memref<3x256xf32, #tpu.memory_space<vmem>>, vector<3x256xf32>,
    return
  }
}

</mosaic_0001>

<bundles_post_ra>
// kernel: squeeze.2
= control target key start
LH: loop header
LB: loop body
LE: loop exit
PB: predicated region body
PF: predicated region fallthrough
CT: control target
= control target key end

     0   :  { %s1126_s12 = smov 3  ;;  %s1128_s13 = smov 12  ;;  %vm424_vm0 = vcmask 1043458   ;;  %vm429_vm1 = vcmask 1045508   ;;  %vm434_vm2 = vcmask 1047558   ;;  %vm387_vm3 = vcmask 1047556   ;;  %s1296_s0 = inlined_call_operand.vmem [shape: bf16[1,4,3,16,16], index: 0, kind: input, shape index: {}]   ;;  %s1297_s1 = inlined_call_operand.vmem [shape: bf16[4,768], index: 1, kind: output, shape index: {}]  }
   0x1   :  { %v1082_v0 = vld [vmem:[%s1296_s0 + $0x48] sm:$0xff]   ;;  %v1085_v1 = vld [vmem:[%s1296_s0 + $0x30] sm:$0xff]   ;;  %v1088_v2 = vld [vmem:[%s1296_s0 + $0x18] sm:$0xff]   ;;  %s1133_s16 = smov 48  ;;  %s1135_s17 = smov 192  ;;  %vm389_vm4 = vcmask 130048  }
   0x2   :  { %v1042_v3 = vunpack.c.l.bf16 %v1082_v0  ;;  %v1043_v4 = vunpack.c.h.bf16 %v1082_v0  ;;  %v1054_v5 = vunpack.c.l.bf16 %v1085_v1  ;;  %v1055_v6 = vunpack.c.h.bf16 %v1085_v1  ;;  %v1077_v7 = vld [vmem:[%s1296_s0] sm:$0xff]   ;;  %v1081_v8 = vld [vmem:[%s1296_s0 + $0x50] sm:$0xff]   ;;  %v1084_v9 = vld [vmem:[%s1296_s0 + $0x38] sm:$0xff]   ;;  %s1149_s26 = smov 3  ;;  %s1154_s29 = smov 12 }
   0x3   :  { %v1066_v10 = vunpack.c.l.bf16 %v1088_v2  ;;  %v1067_v11 = vunpack.c.h.bf16 %v1088_v2  ;;  %v1078_v12 = vunpack.c.l.bf16 %v1077_v7  ;;  %v1079_v13 = vunpack.c.h.bf16 %v1077_v7  ;;  %v1087_v14 = vld [vmem:[%s1296_s0 + $0x20] sm:$0xff]   ;;  %v1090_v15 = vld [vmem:[%s1296_s0 + $0x8] sm:$0xff]   ;;  %v1080_v16 = vld [vmem:[%s1296_s0 + $0x58] sm:$0xff]   ;;  %s1156_s30 = smov 48  ;;  %s1164_s6 = smov 192 }
   0x4   :  { %84 = vst [vmem:[#allocation1 + $0x98] sm:$0xff] %v1043_v4  ;;  %100 = vst [vmem:[#allocation1 + $0x90] sm:$0xff] %v1042_v3  ;;  %v1038_v17 = vunpack.c.l.bf16 %v1081_v8  ;;  %v1039_v18 = vunpack.c.h.bf16 %v1081_v8  ;;  %v1083_v19 = vld [vmem:[%s1296_s0 + $0x40] sm:$0xff]   ;;  %v1086_v20 = vld [vmem:[%s1296_s0 + $0x28] sm:$0xff]   ;;  %v1050_v21 = vunpack.c.l.bf16 %v1084_v9  ;;  %v1051_v22 = vunpack.c.h.bf16 %v1084_v9  ;;  %s1171_s9 = smov 12  ;;  %s1173_s10 = smov 48 }
   0x5   :  { %180 = vst [vmem:[#allocation1 + $0x68] sm:$0xff] %v1055_v6  ;;  %196 = vst [vmem:[#allocation1 + $0x60] sm:$0xff] %v1054_v5  ;;  %v1062_v23 = vunpack.c.l.bf16 %v1087_v14  ;;  %v1063_v24 = vunpack.c.h.bf16 %v1087_v14  ;;  %v1089_v25 = vld [vmem:[%s1296_s0 + $0x10] sm:$0xff]   ;;  %s1169_s0 = smov 3  ;;  %v1074_v26 = vunpack.c.l.bf16 %v1090_v15  ;;  %v1075_v27 = vunpack.c.h.bf16 %v1090_v15  ;;  %s1175_s11 = smov 192 }
   0x6   :  { %276 = vst [vmem:[#allocation1 + $0x38] sm:$0xff] %v1067_v11  ;;  %292 = vst [vmem:[#allocation1 + $0x30] sm:$0xff] %v1066_v10  ;;  %v1034_v28 = vunpack.c.l.bf16 %v1080_v16  ;;  %v1035_v29 = vunpack.c.h.bf16 %v1080_v16  ;;  %v1046_v30 = vunpack.c.l.bf16 %v1083_v19  ;;  %v1047_v31 = vunpack.c.h.bf16 %v1083_v19  ;;  %s493_s14 = smov 3  ;;  %s496_s15 = smov 12 }
   0x7   :  { %371 = vst [vmem:[#allocation1 + $0x8] sm:$0xff] %v1079_v13  ;;  %384 = vst [vmem:[#allocation1] sm:$0xff] %v1078_v12  ;;  %v1058_v32 = vunpack.c.l.bf16 %v1086_v20  ;;  %v1059_v33 = vunpack.c.h.bf16 %v1086_v20  ;;  %v1070_v34 = vunpack.c.l.bf16 %v1089_v25  ;;  %v1071_v35 = vunpack.c.h.bf16 %v1089_v25  ;;  %s501_s18 = smov 48  ;;  %s506_s19 = smov 192 }
   0x8   :  { %52 = vst [vmem:[#allocation1 + $0xa8] sm:$0xff] %v1039_v18  ;;  %68 = vst [vmem:[#allocation1 + $0xa0] sm:$0xff] %v1038_v17  ;;  %s1177_s20 = smov 3  ;;  %s1179_s21 = smov 12  ;;  %vm438_vm5 = vcmask 1048448   ;;  %vm512_vm6 = vcmask 917248  }
   0x9   :  { %148 = vst [vmem:[#allocation1 + $0x78] sm:$0xff] %v1051_v22  ;;  %164 = vst [vmem:[#allocation1 + $0x70] sm:$0xff] %v1050_v21  ;;  %s1181_s22 = smov 48  ;;  %s1183_s23 = smov 192  ;;  %vm586_vm7 = vcmask 786048   ;;  %vm660_vm8 = vcmask 654848  }
   0xa   :  { %244 = vst [vmem:[#allocation1 + $0x48] sm:$0xff] %v1063_v24  ;;  %260 = vst [vmem:[#allocation1 + $0x40] sm:$0xff] %v1062_v23  ;;  %s555_s24 = smov 192  ;;  %s567_s25 = smov 3  ;;  %vm734_vm9 = vcmask 523648   ;;  %vm808_vm10 = vcmask 392448  }
   0xb   :  { %340 = vst [vmem:[#allocation1 + $0x18] sm:$0xff] %v1075_v27  ;;  %356 = vst [vmem:[#allocation1 + $0x10] sm:$0xff] %v1074_v26  ;;  %s575_s27 = smov 48  ;;  %s580_s28 = smov 192  ;;  %vm882_vm11 = vcmask 261248  }
   0xc   :  { %20 = vst [vmem:[#allocation1 + $0xb8] sm:$0xff] %v1035_v29  ;;  %36 = vst [vmem:[#allocation1 + $0xb0] sm:$0xff] %v1034_v28  ;;  %s594_s2 = smov 12  ;;  %s599_s3 = smov 48 }
   0xd   :  { %116 = vst [vmem:[#allocation1 + $0x88] sm:$0xff] %v1047_v31  ;;  %132 = vst [vmem:[#allocation1 + $0x80] sm:$0xff] %v1046_v30  ;;  %s604_s4 = smov 192  ;;  %s616_s5 = smov 3 }
   0xe   :  { %212 = vst [vmem:[#allocation1 + $0x58] sm:$0xff] %v1059_v33  ;;  %228 = vst [vmem:[#allocation1 + $0x50] sm:$0xff] %v1058_v32  ;;  %v420_v36 = vld [vmem:[#allocation1 + $0x7] ss:$48 sm:%s1126_s12]   ;;  %v428_v38 = vld [vmem:[#allocation1 - $0xb1] ss:$48 sm:%s1133_s16]  }
   0xf   :  { %308 = vst [vmem:[#allocation1 + $0x28] sm:$0xff] %v1071_v35  ;;  %324 = vst [vmem:[#allocation1 + $0x20] sm:$0xff] %v1070_v34  ;;  %v423_v37 = vld [vmem:[#allocation1 + $0x7] ss:$48 sm:%s1128_s13]   ;;  %v433_v40 = vld [vmem:[#allocation1 - $0xb1] ss:$48 sm:%s1135_s17]  }
  0x10   :  { %v425_v39 = vsel %vm424_vm0, %v423_v37, %v420_v36  ;;  %v494_v41 = vld [vmem:[#allocation1 + $0x6] ss:$48 sm:%s493_s14]   ;;  %v502_v45 = vld [vmem:[#allocation1 - $0xb2] ss:$48 sm:%s501_s18]   ;;  %s542_s12 = smov 3  ;;  %s545_s13 = smov 12 }
  0x11   :  { %v497_v42 = vld [vmem:[#allocation1 + $0x6] ss:$48 sm:%s496_s15]   ;;  %v430_v43 = vsel %vm429_vm1, %v428_v38, %v425_v39  ;;  %v507_v50 = vld [vmem:[#allocation1 - $0xb2] ss:$48 sm:%s506_s19]   ;;  %s1099_s16 = smov 112   ;;  %s550_s17 = smov 48 }
  0x12   :  { %v499_v44 = vsel %vm424_vm0, %v497_v42, %v494_v41  ;;  %v435_v46 = vsel %vm434_vm2, %v433_v40, %v430_v43  ;;  %v469_v47 = vld [vmem:[#allocation1 + $0x17] ss:$48 sm:%s1149_s26]   ;;  %v477_v49 = vld [vmem:[#allocation1 - $0xa1] ss:$48 sm:%s1156_s30]   ;;  %v543_v53 = vld [vmem:[#allocation1 + $0x16] ss:$48 sm:%s542_s12]  }
  0x13   :  { %v472_v48 = vld [vmem:[#allocation1 + $0x17] ss:$48 sm:%s1154_s29]   ;;  %436 = vrot.lane.b32.xlu0 %v435_v46, %s1099_s16  ;;  %v482_v52 = vld [vmem:[#allocation1 - $0xa1] ss:$48 sm:%s1164_s6]   ;;  %v546_v54 = vld [vmem:[#allocation1 + $0x16] ss:$48 sm:%s545_s13]   ;;  %v504_v59 = vsel %vm429_vm1, %v502_v45, %v499_v44 }
  0x14   :  { %v474_v51 = vsel %vm424_vm0, %v472_v48, %v469_v47  ;;  %v548_v1 = vsel %vm424_vm0, %v546_v54, %v543_v53  ;;  %v509_v7 = vsel %vm434_vm2, %v507_v50, %v504_v59  ;;  %v551_v9 = vld [vmem:[#allocation1 - $0xa2] ss:$48 sm:%s550_s17]   ;;  %s570_s26 = smov 12  ;;  %v568_v12 = vld [vmem:[#allocation1 + $0x5] ss:$48 sm:%s567_s25]   ;;  %s591_s29 = smov 3 }
  0x15   :  { %v479_v55 = vsel %vm429_vm1, %v477_v49, %v474_v51  ;;  %v556_v10 = vld [vmem:[#allocation1 - $0xa2] ss:$48 sm:%s555_s24]   ;;  %v553_v11 = vsel %vm429_vm1, %v551_v9, %v548_v1  ;;  %v571_v13 = vld [vmem:[#allocation1 + $0x5] ss:$48 sm:%s570_s26]   ;;  %v576_v16 = vld [vmem:[#allocation1 - $0xb3] ss:$48 sm:%s575_s27]  }
  0x16   :  { %v444_v56 = vld [vmem:[#allocation1 + $0x27] ss:$48 sm:%s1169_s0]   ;;  %v452_v58 = vld [vmem:[#allocation1 - $0x91] ss:$48 sm:%s1173_s10]   ;;  %v484_v60 = vsel %vm434_vm2, %v482_v52, %v479_v55  ;;  %v518_v63 = vld [vmem:[#allocation1 + $0x26] ss:$48 sm:%s1177_s20]   ;;  %v573_v15 = vsel %vm424_vm0, %v571_v13, %v568_v12  ;;  %v558_v20 = vsel %vm434_vm2, %v556_v10, %v553_v11 }
  0x17   :  { %v447_v57 = vld [vmem:[#allocation1 + $0x27] ss:$48 sm:%s1171_s9]   ;;  %v457_v62 = vld [vmem:[#allocation1 - $0x91] ss:$48 sm:%s1175_s11]   ;;  %v521_v0 = vld [vmem:[#allocation1 + $0x26] ss:$48 sm:%s1179_s21]   ;;  %485 = vrot.lane.b32.xlu1 %v484_v60, %s1099_s16  ;;  %v578_v17 = vsel %vm429_vm1, %v576_v16, %v573_v15 }
  0x18   :  { %v449_v61 = vsel %vm424_vm0, %v447_v57, %v444_v56  ;;  %v523_v3 = vsel %vm424_vm0, %v521_v0, %v518_v63  ;;  %v526_v4 = vld [vmem:[#allocation1 - $0x92] ss:$48 sm:%s1181_s22]   ;;  %s1100_s30 = smov 96   ;;  %v581_v18 = vld [vmem:[#allocation1 - $0xb3] ss:$48 sm:%s580_s28]   ;;  %s619_s6 = smov 12 }
  0x19   :  { %v454_v2 = vsel %vm429_vm1, %v452_v58, %v449_v61  ;;  %v531_v5 = vld [vmem:[#allocation1 - $0x92] ss:$48 sm:%s1183_s23]   ;;  %v528_v8 = vsel %vm429_vm1, %v526_v4, %v523_v3  ;;  %v592_v19 = vld [vmem:[#allocation1 + $0x25] ss:$48 sm:%s591_s29]   ;;  %v600_v22 = vld [vmem:[#allocation1 - $0x93] ss:$48 sm:%s599_s3]   ;;  %v583_v26 = vsel %vm434_vm2, %v581_v18, %v578_v17 }
  0x1a   :  { %v459_v6 = vsel %vm434_vm2, %v457_v62, %v454_v2  ;;  %v533_v14 = vsel %vm434_vm2, %v531_v5, %v528_v8  ;;  %v595_v21 = vld [vmem:[#allocation1 + $0x25] ss:$48 sm:%s594_s2]   ;;  %v605_v24 = vld [vmem:[#allocation1 - $0x93] ss:$48 sm:%s604_s4]   ;;  %s624_s7 = smov 48  ;;  %s629_s8 = smov 192 }
  0x1b   :  { %460 = vrot.lane.b32.xlu0 %v459_v6, %s1099_s16  ;;  %510 = vrot.lane.b32.xlu1 %v509_v7, %s1100_s30  ;;  %v597_v23 = vsel %vm424_vm0, %v595_v21, %v592_v19  ;;  %v617_v25 = vld [vmem:[#allocation1 + $0x15] ss:$48 sm:%s616_s5]   ;;  %v625_v29 = vld [vmem:[#allocation1 - $0xa3] ss:$48 sm:%s624_s7]   ;;  %s641_s0 = smov 3  ;;  %s644_s9 = smov 12 }
  0x1c   :  { %v602_v27 = vsel %vm429_vm1, %v600_v22, %v597_v23  ;;  %v620_v28 = vld [vmem:[#allocation1 + $0x15] ss:$48 sm:%s619_s6]   ;;  %v630_v31 = vld [vmem:[#allocation1 - $0xa3] ss:$48 sm:%s629_s8]   ;;  %v642_v32 = vld [vmem:[#allocation1 + $0x4] ss:$48 sm:%s641_s0]  }
  0x1d   :  { %v622_v30 = vsel %vm424_vm0, %v620_v28, %v617_v25  ;;  %s649_s10 = smov 48  ;;  %v607_v33 = vsel %vm434_vm2, %v605_v24, %v602_v27  ;;  %v645_v35 = vld [vmem:[#allocation1 + $0x4] ss:$48 sm:%s644_s9]   ;;  %s654_s11 = smov 192 }
  0x1e   :  { %v627_v34 = vsel %vm429_vm1, %v625_v29, %v622_v30  ;;  %v650_v36 = vld [vmem:[#allocation1 - $0xb4] ss:$48 sm:%s649_s10]   ;;  %s1101_s14 = smov 80   ;;  %v647_v37 = vsel %vm424_vm0, %v645_v35, %v642_v32  ;;  %s665_s15 = smov 3 }
  0x1f   :  { %534 = vrot.lane.b32.xlu0 %v533_v14, %s1100_s30  ;;  %559 = vrot.lane.b32.xlu1 %v558_v20, %s1100_s30  ;;  %v655_v38 = vld [vmem:[#allocation1 - $0xb4] ss:$48 sm:%s654_s11]   ;;  %s668_s18 = smov 12  ;;  %v632_v39 = vsel %vm434_vm2, %v630_v31, %v627_v34  ;;  %v652_v40 = vsel %vm429_vm1, %v650_v36, %v647_v37  ;;  %v666_v41 = vld [vmem:[#allocation1 + $0x24] ss:$48 sm:%s665_s15]   ;;  %s673_s19 = smov 48 }
  0x20   :  { %v669_v42 = vld [vmem:[#allocation1 + $0x24] ss:$48 sm:%s668_s18]   ;;  %s678_s20 = smov 192  ;;  %v674_v44 = vld [vmem:[#allocation1 - $0x94] ss:$48 sm:%s673_s19]   ;;  %s690_s21 = smov 3  ;;  %v657_v46 = vsel %vm434_vm2, %v655_v38, %v652_v40 }
  0x21   :  { %v671_v43 = vsel %vm424_vm0, %v669_v42, %v666_v41  ;;  %v679_v45 = vld [vmem:[#allocation1 - $0x94] ss:$48 sm:%s678_s20]   ;;  %s693_s22 = smov 12  ;;  %v691_v48 = vld [vmem:[#allocation1 + $0x14] ss:$48 sm:%s690_s21]   ;;  %s698_s23 = smov 48 }
  0x22   :  { %v676_v47 = vsel %vm429_vm1, %v674_v44, %v671_v43  ;;  %v694_v49 = vld [vmem:[#allocation1 + $0x14] ss:$48 sm:%s693_s22]   ;;  %s703_s12 = smov 192  ;;  %v699_v51 = vld [vmem:[#allocation1 - $0xa4] ss:$48 sm:%s698_s23]   ;;  %s715_s13 = smov 3 }
  0x23   :  { %584 = vrot.lane.b32.xlu0 %v583_v26, %s1101_s14  ;;  %608 = vrot.lane.b32.xlu1 %v607_v33, %s1101_s14  ;;  %v696_v50 = vsel %vm424_vm0, %v694_v49, %v691_v48  ;;  %v704_v52 = vld [vmem:[#allocation1 - $0xa4] ss:$48 sm:%s703_s12]   ;;  %s718_s16 = smov 12  ;;  %v681_v53 = vsel %vm434_vm2, %v679_v45, %v676_v47  ;;  %v716_v55 = vld [vmem:[#allocation1 + $0x3] ss:$48 sm:%s715_s13]   ;;  %s723_s17 = smov 48 }
  0x24   :  { %v701_v54 = vsel %vm429_vm1, %v699_v51, %v696_v50  ;;  %v719_v56 = vld [vmem:[#allocation1 + $0x3] ss:$48 sm:%s718_s16]   ;;  %s728_s24 = smov 192  ;;  %s1102_s25 = smov 64   ;;  %v724_v58 = vld [vmem:[#allocation1 - $0xb5] ss:$48 sm:%s723_s17]  }
  0x25   :  { %v721_v57 = vsel %vm424_vm0, %v719_v56, %v716_v55  ;;  %v729_v59 = vld [vmem:[#allocation1 - $0xb5] ss:$48 sm:%s728_s24]   ;;  %s739_s26 = smov 3  ;;  %v706_v60 = vsel %vm434_vm2, %v704_v52, %v701_v54  ;;  %s742_s27 = smov 12 }
  0x26   :  { %v726_v61 = vsel %vm429_vm1, %v724_v58, %v721_v57  ;;  %v740_v62 = vld [vmem:[#allocation1 + $0x23] ss:$48 sm:%s739_s26]   ;;  %s747_s28 = smov 48  ;;  %s752_s29 = smov 192 }
  0x27   :  { %633 = vrot.lane.b32.xlu0 %v632_v39, %s1101_s14  ;;  %658 = vrot.lane.b32.xlu1 %v657_v46, %s1102_s25  ;;  %v743_v63 = vld [vmem:[#allocation1 + $0x23] ss:$48 sm:%s742_s27]   ;;  %v748_v0 = vld [vmem:[#allocation1 - $0x95] ss:$48 sm:%s747_s28]   ;;  %s764_s30 = smov 3  ;;  %v731_v1 = vsel %vm434_vm2, %v729_v59, %v726_v61  ;;  %s767_s2 = smov 12 }
  0x28   :  { %v745_v2 = vsel %vm424_vm0, %v743_v63, %v740_v62  ;;  %v753_v3 = vld [vmem:[#allocation1 - $0x95] ss:$48 sm:%s752_s29]   ;;  %v765_v4 = vld [vmem:[#allocation1 + $0x13] ss:$48 sm:%s764_s30]   ;;  %s772_s3 = smov 48  ;;  %s777_s4 = smov 192 }
  0x29   :  { %v750_v5 = vsel %vm429_vm1, %v748_v0, %v745_v2  ;;  %v768_v6 = vld [vmem:[#allocation1 + $0x13] ss:$48 sm:%s767_s2]   ;;  %v773_v7 = vld [vmem:[#allocation1 - $0xa5] ss:$48 sm:%s772_s3]   ;;  %s789_s5 = smov 3  ;;  %s792_s6 = smov 12 }
  0x2a   :  { %v755_v8 = vsel %vm434_vm2, %v753_v3, %v750_v5  ;;  %v770_v9 = vsel %vm424_vm0, %v768_v6, %v765_v4  ;;  %v778_v10 = vld [vmem:[#allocation1 - $0xa5] ss:$48 sm:%s777_s4]   ;;  %v790_v11 = vld [vmem:[#allocation1 + $0x2] ss:$48 sm:%s789_s5]   ;;  %s797_s7 = smov 48  ;;  %s1103_s8 = smov 48  }
  0x2b   :  { %682 = vrot.lane.b32.xlu0 %v681_v53, %s1102_s25  ;;  %707 = vrot.lane.b32.xlu1 %v706_v60, %s1102_s25  ;;  %v775_v12 = vsel %vm429_vm1, %v773_v7, %v770_v9  ;;  %v793_v13 = vld [vmem:[#allocation1 + $0x2] ss:$48 sm:%s792_s6]   ;;  %v798_v14 = vld [vmem:[#allocation1 - $0xb6] ss:$48 sm:%s797_s7]   ;;  %s802_s0 = smov 192  ;;  %s813_s9 = smov 3 }
  0x2c   :  { %v780_v15 = vsel %vm434_vm2, %v778_v10, %v775_v12  ;;  %v795_v16 = vsel %vm424_vm0, %v793_v13, %v790_v11  ;;  %v803_v17 = vld [vmem:[#allocation1 - $0xb6] ss:$48 sm:%s802_s0]   ;;  %s816_s10 = smov 12  ;;  %v814_v19 = vld [vmem:[#allocation1 + $0x22] ss:$48 sm:%s813_s9]   ;;  %s821_s11 = smov 48 }
  0x2d   :  { %v800_v18 = vsel %vm429_vm1, %v798_v14, %v795_v16  ;;  %v817_v20 = vld [vmem:[#allocation1 + $0x22] ss:$48 sm:%s816_s10]   ;;  %s826_s14 = smov 192  ;;  %v822_v23 = vld [vmem:[#allocation1 - $0x96] ss:$48 sm:%s821_s11]   ;;  %s838_s15 = smov 3 }
  0x2e   :  { %v805_v21 = vsel %vm434_vm2, %v803_v17, %v800_v18  ;;  %v819_v22 = vsel %vm424_vm0, %v817_v20, %v814_v19  ;;  %v827_v24 = vld [vmem:[#allocation1 - $0x96] ss:$48 sm:%s826_s14]   ;;  %s841_s18 = smov 12  ;;  %v839_v26 = vld [vmem:[#allocation1 + $0x12] ss:$48 sm:%s838_s15]   ;;  %s846_s19 = smov 48 }
  0x2f   :  { %732 = vrot.lane.b32.xlu0 %v731_v1, %s1103_s8  ;;  %756 = vrot.lane.b32.xlu1 %v755_v8, %s1103_s8  ;;  %v824_v25 = vsel %vm429_vm1, %v822_v23, %v819_v22  ;;  %v842_v27 = vld [vmem:[#allocation1 + $0x12] ss:$48 sm:%s841_s18]   ;;  %s851_s20 = smov 192  ;;  %v847_v30 = vld [vmem:[#allocation1 - $0xa6] ss:$48 sm:%s846_s19]   ;;  %s863_s21 = smov 3 }
  0x30   :  { %v829_v28 = vsel %vm434_vm2, %v827_v24, %v824_v25  ;;  %v844_v29 = vsel %vm424_vm0, %v842_v27, %v839_v26  ;;  %v852_v31 = vld [vmem:[#allocation1 - $0xa6] ss:$48 sm:%s851_s20]   ;;  %s866_s22 = smov 12  ;;  %s1104_s23 = smov 32   ;;  %v864_v33 = vld [vmem:[#allocation1 + $0x1] ss:$48 sm:%s863_s21]  }
  0x31   :  { %v849_v32 = vsel %vm429_vm1, %v847_v30, %v844_v29  ;;  %v867_v34 = vld [vmem:[#allocation1 + $0x1] ss:$48 sm:%s866_s22]   ;;  %s871_s12 = smov 48  ;;  %s876_s13 = smov 192  ;;  %v1106_v23 = vmov 0.0  }
  0x32   :  { %v854_v35 = vsel %vm434_vm2, %v852_v31, %v849_v32  ;;  %v869_v36 = vsel %vm424_vm0, %v867_v34, %v864_v33  ;;  %v872_v37 = vld [vmem:[#allocation1 - $0xb7] ss:$48 sm:%s871_s12]   ;;  %s887_s16 = smov 3  ;;  %s890_s17 = smov 12 }
  0x33   :  { %781 = vrot.lane.b32.xlu0 %v780_v15, %s1103_s8  ;;  %806 = vrot.lane.b32.xlu1 %v805_v21, %s1104_s23  ;;  %v877_v38 = vld [vmem:[#allocation1 - $0xb7] ss:$48 sm:%s876_s13]   ;;  %v874_v39 = vsel %vm429_vm1, %v872_v37, %v869_v36  ;;  %v888_v40 = vld [vmem:[#allocation1 + $0x21] ss:$48 sm:%s887_s16]   ;;  %s895_s24 = smov 48  ;;  %s900_s25 = smov 192 }
  0x34   :  { %v879_v41 = vsel %vm434_vm2, %v877_v38, %v874_v39  ;;  %v891_v42 = vld [vmem:[#allocation1 + $0x21] ss:$48 sm:%s890_s17]   ;;  %v896_v43 = vld [vmem:[#allocation1 - $0x97] ss:$48 sm:%s895_s24]   ;;  %s912_s26 = smov 3  ;;  %s915_s27 = smov 12 }
  0x35   :  { %v893_v44 = vsel %vm424_vm0, %v891_v42, %v888_v40  ;;  %v901_v45 = vld [vmem:[#allocation1 - $0x97] ss:$48 sm:%s900_s25]   ;;  %v913_v46 = vld [vmem:[#allocation1 + $0x11] ss:$48 sm:%s912_s26]   ;;  %s920_s28 = smov 48  ;;  %s925_s29 = smov 192 }
  0x36   :  { %v898_v47 = vsel %vm429_vm1, %v896_v43, %v893_v44  ;;  %v916_v48 = vld [vmem:[#allocation1 + $0x11] ss:$48 sm:%s915_s27]   ;;  %v921_v49 = vld [vmem:[#allocation1 - $0xa7] ss:$48 sm:%s920_s28]   ;;  %s1105_s30 = smov 16  }
  0x37   :  { %830 = vrot.lane.b32.xlu0 %v829_v28, %s1104_s23  ;;  %855 = vrot.lane.b32.xlu1 %v854_v35, %s1104_s23  ;;  %v903_v50 = vsel %vm434_vm2, %v901_v45, %v898_v47  ;;  %v918_v51 = vsel %vm424_vm0, %v916_v48, %v913_v46  ;;  %v926_v52 = vld [vmem:[#allocation1 - $0xa7] ss:$48 sm:%s925_s29]   ;;  %v385_v53 = vld [vmem:[#allocation1] ss:$8 sm:$0xf]  }
  0x38   :  { %v923_v54 = vsel %vm429_vm1, %v921_v49, %v918_v51  ;;  %v386_v55 = vld [vmem:[#allocation1] ss:$8 sm:$0xf0]  }
  0x39   :  { %v395_v56 = vld [vmem:[#allocation1 + $0x40] ss:$8 sm:$0xf]   ;;  %v928_v57 = vsel %vm434_vm2, %v926_v52, %v923_v54  ;;  %v388_v58 = vsel %vm387_vm3, %v386_v55, %v385_v53 }
  0x3a   :  { %v397_v59 = vld [vmem:[#allocation1 + $0x40] ss:$8 sm:$0xf0]   ;;  %390 = vst.msk [vmem:[#allocation0] ss:$8 sm:$0xf] %vm389_vm4, %v388_v58  }
  0x3b   :  { %880 = vrot.lane.b32.xlu0 %v879_v41, %s1105_s30  ;;  %904 = vrot.lane.b32.xlu1 %v903_v50, %s1105_s30  ;;  %v406_v60 = vld [vmem:[#allocation1 + $0x80] ss:$8 sm:$0xf]   ;;  %393 = vst.msk [vmem:[#allocation0 - $0x2f] ss:$8 sm:$0xc0] %vm389_vm4, %v388_v58   ;;  %v399_v61 = vsel %vm387_vm3, %v397_v59, %v395_v56 }
  0x3c   :  { %v408_v62 = vld [vmem:[#allocation1 + $0x80] ss:$8 sm:$0xf0]   ;;  %391 = vst.msk [vmem:[#allocation0] ss:$8 sm:$0x30] %vm389_vm4, %v388_v58  }
  0x3d   :  { %404 = vst.msk [vmem:[#allocation0 - $0x1e] ss:$8 sm:$0xf0] %vm389_vm4, %v399_v61   ;;  %v410_v63 = vsel %vm387_vm3, %v408_v62, %v406_v60  ;;  %402 = vst.msk [vmem:[#allocation0 + $0x11] ss:$8 sm:$0xf] %vm389_vm4, %v399_v61  }
  0x3e   :  { %415 = vst.msk [vmem:[#allocation0 - $0xd] ss:$8 sm:$0x3c] %vm389_vm4, %v410_v63   ;;  %413 = vst.msk [vmem:[#allocation0 + $0x22] ss:$8 sm:$0x3] %vm389_vm4, %v410_v63  }
  0x3f   :  { %929 = vrot.lane.b32.xlu0 %v928_v57, %s1105_s30  ;;  %417 = vst.msk [vmem:[#allocation0 - $0xd] ss:$8 sm:$0xc0] %vm389_vm4, %v410_v63  }
  0x85   :  { %v437_v0 = vpop.permute.xlu0 %436  }
  0x86   :  { %439 = vst.msk [vmem:[#allocation0] sm:$0xf] %vm438_vm5, %v437_v0   ;;  %441 = vst.msk [vmem:[#allocation0 + $0x4] sm:$0xf0] %vm438_vm5, %v437_v0  }
  0x89   :  { %v486_v1 = vpop.permute.xlu1 %485  }
  0x8a   :  { %489 = vst.msk [vmem:[#allocation0 + $0x10] sm:$0xf] %vm438_vm5, %v486_v1   ;;  %491 = vst.msk [vmem:[#allocation0 + $0x14] sm:$0xf0] %vm438_vm5, %v486_v1  }
  0x8d   :  { %v461_v2 = vpop.permute.xlu0 %460   ;;  %v511_v3 = vpop.permute.xlu1 %510  }
  0x8e   :  { %464 = vst.msk [vmem:[#allocation0 + $0x20] sm:$0xf] %vm438_vm5, %v461_v2   ;;  %466 = vst.msk [vmem:[#allocation0 + $0x24] sm:$0xf0] %vm438_vm5, %v461_v2  }
  0x8f   :  { %513 = vst.msk [vmem:[#allocation0] sm:$0xf] %vm512_vm6, %v511_v3   ;;  %515 = vst.msk [vmem:[#allocation0 + $0x4] sm:$0xf0] %vm512_vm6, %v511_v3  }
  0x91   :  { %v535_v4 = vpop.permute.xlu0 %534   ;;  %v560_v5 = vpop.permute.xlu1 %559  }
  0x92   :  { %538 = vst.msk [vmem:[#allocation0 + $0x20] sm:$0xf] %vm512_vm6, %v535_v4   ;;  %540 = vst.msk [vmem:[#allocation0 + $0x24] sm:$0xf0] %vm512_vm6, %v535_v4  }
  0x93   :  { %563 = vst.msk [vmem:[#allocation0 + $0x10] sm:$0xf] %vm512_vm6, %v560_v5   ;;  %565 = vst.msk [vmem:[#allocation0 + $0x14] sm:$0xf0] %vm512_vm6, %v560_v5  }
  0x95   :  { %v585_v6 = vpop.permute.xlu0 %584   ;;  %v609_v7 = vpop.permute.xlu1 %608  }
  0x96   :  { %587 = vst.msk [vmem:[#allocation0] sm:$0xf] %vm586_vm7, %v585_v6   ;;  %589 = vst.msk [vmem:[#allocation0 + $0x4] sm:$0xf0] %vm586_vm7, %v585_v6  }
  0x97   :  { %612 = vst.msk [vmem:[#allocation0 + $0x20] sm:$0xf] %vm586_vm7, %v609_v7   ;;  %614 = vst.msk [vmem:[#allocation0 + $0x24] sm:$0xf0] %vm586_vm7, %v609_v7  }
  0x99   :  { %v634_v8 = vpop.permute.xlu0 %633   ;;  %v659_v9 = vpop.permute.xlu1 %658  }
  0x9a   :  { %637 = vst.msk [vmem:[#allocation0 + $0x10] sm:$0xf] %vm586_vm7, %v634_v8   ;;  %639 = vst.msk [vmem:[#allocation0 + $0x14] sm:$0xf0] %vm586_vm7, %v634_v8  }
  0x9b   :  { %661 = vst.msk [vmem:[#allocation0] sm:$0xf] %vm660_vm8, %v659_v9   ;;  %663 = vst.msk [vmem:[#allocation0 + $0x4] sm:$0xf0] %vm660_vm8, %v659_v9  }
  0x9d   :  { %v683_v10 = vpop.permute.xlu0 %682   ;;  %v708_v11 = vpop.permute.xlu1 %707  }
  0x9e   :  { %686 = vst.msk [vmem:[#allocation0 + $0x20] sm:$0xf] %vm660_vm8, %v683_v10   ;;  %688 = vst.msk [vmem:[#allocation0 + $0x24] sm:$0xf0] %vm660_vm8, %v683_v10  }
  0x9f   :  { %711 = vst.msk [vmem:[#allocation0 + $0x10] sm:$0xf] %vm660_vm8, %v708_v11   ;;  %713 = vst.msk [vmem:[#allocation0 + $0x14] sm:$0xf0] %vm660_vm8, %v708_v11  }
  0xa1   :  { %v733_v12 = vpop.permute.xlu0 %732   ;;  %v757_v13 = vpop.permute.xlu1 %756  }
  0xa2   :  { %735 = vst.msk [vmem:[#allocation0] sm:$0xf] %vm734_vm9, %v733_v12   ;;  %737 = vst.msk [vmem:[#allocation0 + $0x4] sm:$0xf0] %vm734_vm9, %v733_v12  }
  0xa3   :  { %760 = vst.msk [vmem:[#allocation0 + $0x20] sm:$0xf] %vm734_vm9, %v757_v13   ;;  %762 = vst.msk [vmem:[#allocation0 + $0x24] sm:$0xf0] %vm734_vm9, %v757_v13  }
  0xa5   :  { %v782_v14 = vpop.permute.xlu0 %781   ;;  %v807_v15 = vpop.permute.xlu1 %806  }
  0xa6   :  { %785 = vst.msk [vmem:[#allocation0 + $0x10] sm:$0xf] %vm734_vm9, %v782_v14   ;;  %787 = vst.msk [vmem:[#allocation0 + $0x14] sm:$0xf0] %vm734_vm9, %v782_v14  }
  0xa7   :  { %809 = vst.msk [vmem:[#allocation0] sm:$0xf] %vm808_vm10, %v807_v15   ;;  %811 = vst.msk [vmem:[#allocation0 + $0x4] sm:$0xf0] %vm808_vm10, %v807_v15  }
  0xa9   :  { %v831_v16 = vpop.permute.xlu0 %830   ;;  %v856_v17 = vpop.permute.xlu1 %855  }
  0xaa   :  { %834 = vst.msk [vmem:[#allocation0 + $0x20] sm:$0xf] %vm808_vm10, %v831_v16   ;;  %836 = vst.msk [vmem:[#allocation0 + $0x24] sm:$0xf0] %vm808_vm10, %v831_v16  }
  0xab   :  { %859 = vst.msk [vmem:[#allocation0 + $0x10] sm:$0xf] %vm808_vm10, %v856_v17   ;;  %861 = vst.msk [vmem:[#allocation0 + $0x14] sm:$0xf0] %vm808_vm10, %v856_v17  }
  0xad   :  { %v881_v18 = vpop.permute.xlu0 %880   ;;  %v905_v19 = vpop.permute.xlu1 %904  }
  0xae   :  { %883 = vst.msk [vmem:[#allocation0] sm:$0xf] %vm882_vm11, %v881_v18   ;;  %885 = vst.msk [vmem:[#allocation0 + $0x4] sm:$0xf0] %vm882_vm11, %v881_v18  }
  0xaf   :  { %908 = vst.msk [vmem:[#allocation0 + $0x20] sm:$0xf] %vm882_vm11, %v905_v19   ;;  %910 = vst.msk [vmem:[#allocation0 + $0x24] sm:$0xf0] %vm882_vm11, %v905_v19  }
  0xb1   :  { %v930_v20 = vpop.permute.xlu0 %929  }
  0xb2   :  { %933 = vst.msk [vmem:[#allocation0 + $0x10] sm:$0xf] %vm882_vm11, %v930_v20   ;;  %935 = vst.msk [vmem:[#allocation0 + $0x14] sm:$0xf0] %vm882_vm11, %v930_v20  }
  0xb5   :  { %v940_v21 = vld [vmem:[#allocation0] sm:$0xf]  ;;  %v945_v22 = vld [vmem:[#allocation0 + $0x8] sm:$0xf] }
  0xb6   :  { %v941_v24 = vpack.c.bf16 %v1106_v23, %v940_v21  ;;  %v946_v25 = vpack.c.bf16 %v1106_v23, %v945_v22  ;;  %v965_v26 = vld [vmem:[#allocation0 + $0x20] sm:$0xf]  ;;  %v972_v27 = vld [vmem:[#allocation0 + $0x28] sm:$0xf] }
  0xb7   :  { %v966_v28 = vpack.c.bf16 %v1106_v23, %v965_v26  ;;  %v973_v29 = vpack.c.bf16 %v1106_v23, %v972_v27 }
  0xb8   :  { %943 = vst [vmem:[%s1297_s1] sm:$0x3] %v941_v24  ;;  %1027 = vst [vmem:[%s1297_s1 + $0x2] sm:$0x3] %v946_v25 }
  0xb9   :  { %v951_v30 = vld [vmem:[#allocation0 + $0x10] sm:$0xf]  ;;  %v958_v31 = vld [vmem:[#allocation0 + $0x18] sm:$0xf]  ;;  %1030 = vst [vmem:[%s1297_s1 + $0x8] sm:$0x3] %v966_v28 }
  0xba   :  { %1031 = vst [vmem:[%s1297_s1 + $0xa] sm:$0x3] %v973_v29  ;;  %v952_v32 = vpack.c.bf16 %v1106_v23, %v951_v30  ;;  %v959_v33 = vpack.c.bf16 %v1106_v23, %v958_v31 }
  0xbc   :  { %1028 = vst [vmem:[%s1297_s1 + $0x4] sm:$0x3] %v952_v32  ;;  %1029 = vst [vmem:[%s1297_s1 + $0x6] sm:$0x3] %v959_v33 }

// kernel: squeeze.0
= control target key start
LH: loop header
LB: loop body
LE: loop exit
PB: predicated region body
PF: predicated region fallthrough
CT: control target
= control target key end

     0   :  { %vm66_vm0 = vcmask 31744   ;;  %s104_s8 = smov 4   ;;  %s105_s9 = smov 8   ;;  %vm72_vm1 = vcmask 130144   ;;  %vm78_vm2 = vcmask 97344   ;;  %vm84_vm3 = vcmask 64544   ;;  %s123_s0 = inlined_call_operand.vmem [shape: bf16[1,4,4,4], index: 0, kind: input, shape index: {}]   ;;  %s124_s1 = inlined_call_operand.vmem [shape: bf16[4,16], index: 1, kind: output, shape index: {}]  }
   0x1   :  { %v96_v0 = vld [vmem:[%s123_s0] sm:$0xff]   ;;  %s103_s0 = smov 12   ;;  %v106_v11 = vmov 0.0  }
   0x2   :  { %v17_v1 = vunpack.c.h.bf16 %v96_v0  ;;  %v48_v2 = vunpack.c.l.bf16 %v96_v0 }
   0x4   :  { %20 = vst [vmem:[#allocation1 + $0x10] ss:$8 sps:$4 sm:$0xff] %v17_v1   ;;  %51 = vst [vmem:[#allocation1] ss:$8 sps:$4 sm:$0xff] %v48_v2  }
   0xb   :  { %v69_v3 = vld [vmem:[#allocation1 + $0x3] ss:$8 sm:$0xf]   ;;  %v81_v4 = vld [vmem:[#allocation1 + $0x1] ss:$8 sm:$0xf]  }
   0xc   :  { %70 = vrot.lane.b32.xlu0 %v69_v3, %s103_s0  ;;  %v65_v5 = vld [vmem:[#allocation1] ss:$8 sm:$0xf]   ;;  %v75_v6 = vld [vmem:[#allocation1 + $0x2] ss:$8 sm:$0xf]   ;;  %82 = vrot.lane.b32.xlu1 %v81_v4, %s104_s8 }
   0xd   :  { %67 = vst.msk [vmem:[#allocation0] sm:$0xf] %vm66_vm0, %v65_v5  }
  0x10   :  { %76 = vrot.lane.b32.xlu0 %v75_v6, %s105_s9 }
  0x7e   :  { %v71_v7 = vpop.permute.xlu0 %70   ;;  %v83_v8 = vpop.permute.xlu1 %82  }
  0x7f   :  { %73 = vst.msk [vmem:[#allocation0] sm:$0xf] %vm72_vm1, %v71_v7  }
  0x82   :  { %v77_v9 = vpop.permute.xlu0 %76  }
  0x83   :  { %79 = vst.msk [vmem:[#allocation0] sm:$0xf] %vm78_vm2, %v77_v9  }
  0x84   :  { %85 = vst.msk [vmem:[#allocation0] sm:$0xf] %vm84_vm3, %v83_v8  }
  0x8b   :  { %v90_v10 = vld [vmem:[#allocation0] sm:$0xf] }
  0x8c   :  { %v91_v12 = vpack.c.bf16 %v106_v11, %v90_v10 }
  0x8e   :  { %93 = vst [vmem:[%s124_s1] sm:$0x3] %v91_v12 }

// kernel: model_package_forward.1
= control target key start
LH: loop header
LB: loop body
LE: loop exit
PB: predicated region body
PF: predicated region fallthrough
CT: control target
= control target key end

     0   :  { %10 = vsyncpa [#allocation3], 0  ;;  %s2801_s0 = inlined_call_operand.vmem [shape: bf16[4,800], index: 0, kind: input, shape index: {}]   ;;  %s2802_s1 = inlined_call_operand.hbm [shape: bf16[800,384], index: 1, kind: input, shape index: {}]   ;;  %s2803_s2 = inlined_call_operand.hbm [shape: f32[1,384], index: 2, kind: input, shape index: {}]   ;;  %s2804_s3 = inlined_call_operand.vmem [shape: bf16[128,768], index: 3, kind: input, shape index: {}]   ;;  %s2805_s4 = inlined_call_operand.vmem [shape: f32[3,256], index: 4, kind: input, shape index: {}]   ;;  %s2806_s5 = inlined_call_operand.vmem [shape: f32[3,256], index: 5, kind: output, shape index: {}]  }
   0x1   :  { %11 = vsyncpa [#allocation5], 0  ;;  %s2531_s18 = smov [#allocation2]   ;;  %s2483_s22 = scalar_lea.hbm %s2802_s1, 19200 }
   0x2   :  { %s19_s19 = sshll.u32 %s2531_s18, 4  ;;  %p2484_p0 = scmp.ne.s32.totalorder %s2802_s1, %s2483_s22  ;;  %s20_s19 = int_to_ptr.vmem [resolvable:$true] %s19_s19 }
   0x3   :  { %p2487_p1 = scmp.lt.u32.totalorder %s2483_s22, %s2802_s1 }
   0x5   :  { %p2489_p2 = pnand %p2487_p1, %p2484_p0 }
   0x7   :  { %2492 = shalt.err (!%p2489_p2)
}
   0x8   :  { %s2493_s27 = scalar_lea.vmem %s20_s19, 19200  ;;  %p2498_p4 = scmp.lt.s32.totalorder %s20_s19, %s20_s19 }
   0x9   :  { %p2494_p3 = scmp.ne.s32.totalorder %s20_s19, %s2493_s27  ;;  %p2499_p5 = scmp.lt.s32.totalorder %s2493_s27, %s2493_s27 }
   0xb   :  { %p2500_p6 = por %p2499_p5, %p2498_p4 }
   0xd   :  { %p2501_p7 = pnand %p2500_p6, %p2494_p3 }
   0xf   :  { %2504 = shalt.err (!%p2501_p7)
}
  0x10   :  { %s2532_s28 = smov 192   ;;  %s2533_s29 = smov 12  }
  0x11   :  { %25 = dma.hbm_to_vmem [thread:$0]  %s2802_s1, 19200, %s20_s19, [#allocation3], %s2532_s28, %s2532_s28, %s2533_s29  }
  0x12   :  { %s2534_s7 = smov [#allocation4]   ;;  %s2505_s11 = scalar_lea.hbm %s2803_s2, 48 }
  0x13   :  { %s32_s8 = sshll.u32 %s2534_s7, 4  ;;  %p2506_p8 = scmp.ne.s32.totalorder %s2803_s2, %s2505_s11  ;;  %s33_s8 = int_to_ptr.vmem [resolvable:$true] %s32_s8 }
  0x14   :  { %p2509_p9 = scmp.lt.u32.totalorder %s2505_s11, %s2803_s2 }
  0x16   :  { %p2511_p10 = pnand %p2509_p9, %p2506_p8 }
  0x18   :  { %2514 = shalt.err (!%p2511_p10)
}
  0x19   :  { %s2515_s16 = scalar_lea.vmem %s33_s8, 48  ;;  %s2519_s1 = scalar_lea.vmem %s33_s8, 64 }
  0x1a   :  { %p2516_p11 = scmp.ne.s32.totalorder %s33_s8, %s2515_s16  ;;  %p2520_p12 = scmp.lt.s32.totalorder %s33_s8, %s33_s8 }
  0x1b   :  { %p2521_p13 = scmp.lt.s32.totalorder %s2519_s1, %s2515_s16 }
  0x1d   :  { %p2522_p0 = por %p2521_p13, %p2520_p12 }
  0x1f   :  { %p2523_p1 = pnand %p2522_p0, %p2516_p11 }
  0x21   :  { %2526 = shalt.err (!%p2523_p1)
}
  0x22   :  { %35 = dma.hbm_to_vmem [thread:$0]  %s2803_s2, 48, %s33_s8, [#allocation5]  }
  0x23   :  { %2527 = dma.done.wait [#allocation3], 19200  }
  0x24   :  { %2528 = vsyncadd [#allocation3], 4294948096 }
  0x25   :  { %2529 = dma.done.wait [#allocation5], 48  }
  0x26   :  { %2530 = vsyncadd [#allocation5], 4294967248  ;;  %v2208_v0 = vld [vmem:[#allocation2 + $0x4] ss:$12 sps:$4 sm:$0xff]   ;;  %v2210_v1 = vld [vmem:[#allocation2] ss:$12 sps:$4 sm:$0xff]   ;;  %v251_v7 = vlaneseq }
  0x27   :  { %1111 = vmatprep.subr.bf16.mxu0 %v2208_v0  ;;  %v2211_v2 = vld [vmem:[#allocation2 + $0x1c] ss:$12 sps:$4 sm:$0xff]   ;;  %v2213_v3 = vld [vmem:[#allocation2 + $0x18] ss:$12 sps:$4 sm:$0xff]   ;;  %v2214_v4 = vld [vmem:[#allocation2 + $0x34] ss:$12 sps:$4 sm:$0xff]  }
  0x28   :  { %1112 = vmatpush1.bf16.msra.mxu0 %v2210_v1  ;;  %v2216_v5 = vld [vmem:[#allocation2 + $0x30] ss:$12 sps:$4 sm:$0xff]   ;;  %v2217_v6 = vld [vmem:[#allocation2 + $0x4c] ss:$12 sps:$4 sm:$0xff]   ;;  %v2535_v8 = vmov 1983009808  }
  0x29   :  { %1113 = vmatprep.subr.bf16.mxu0 %v2211_v2  ;;  %v270_v9 = vunpack.c.l.s4 %v2535_v8  ;;  %v2219_v10 = vld [vmem:[#allocation2 + $0x48] ss:$12 sps:$4 sm:$0xff]   ;;  %v2220_v11 = vld [vmem:[#allocation2 + $0x64] ss:$12 sps:$4 sm:$0xff]   ;;  %v2593_v12 = vshrl.u32 %v251_v7, 7  ;;  %vm2537_vm0 = vmmov 0  }
  0x2a   :  { %v2222_v14 = vld [vmem:[#allocation2 + $0x60] ss:$12 sps:$4 sm:$0xff]   ;;  %v2223_v15 = vld [vmem:[#allocation2 + $0x7c] ss:$12 sps:$4 sm:$0xff]   ;;  %v2225_v17 = vld [vmem:[#allocation2 + $0x78] ss:$12 sps:$4 sm:$0xff]  }
  0x2b   :  { %v271_v13 = vunpack.c.0.s8 %v270_v9  ;;  %v2226_v18 = vld [vmem:[#allocation2 + $0x94] ss:$12 sps:$4 sm:$0xff]   ;;  %v2228_v21 = vld [vmem:[#allocation2 + $0x90] ss:$12 sps:$4 sm:$0xff]   ;;  %v2229_v22 = vld [vmem:[#allocation2 + $0xac] ss:$12 sps:$4 sm:$0xff]  }
  0x2c   :  { %1114 = vmatpush1.bf16.msra.mxu0 %v2213_v3  ;;  %v2601_v19 = vld [vmem:[%s2801_s0] sm:$0xff]  ;;  %v2231_v24 = vld [vmem:[#allocation2 + $0xa8] ss:$12 sps:$4 sm:$0xff]   ;;  %v2240_v34 = vld [vmem:[#allocation2 + $0xf0] ss:$12 sps:$4 sm:$0xff]   ;;  %vm1107_vm1 = vcmask 261120  }
  0x2d   :  { %1115 = vmatprep.subr.bf16.mxu0 %v2214_v4  ;;  %v2596_v16 = vsub.s32 %v271_v13, %v2593_v12  ;;  %v2232_v25 = vld [vmem:[#allocation2 + $0xc4] ss:$12 sps:$4 sm:$0xff]   ;;  %v2234_v26 = vld [vmem:[#allocation2 + $0xc0] ss:$12 sps:$4 sm:$0xff]   ;;  %v2235_v27 = vld [vmem:[#allocation2 + $0xdc] ss:$12 sps:$4 sm:$0xff]   ;;  %v268_v54 = vcombine.high %v2601_v19, %v2601_v19 }
  0x2e   :  { %v2281_v28 = vld [vmem:[#allocation2 + $0xc8] ss:$12 sps:$4 sm:$0xff]   ;;  %v2237_v30 = vld [vmem:[#allocation2 + $0xd8] ss:$12 sps:$4 sm:$0xff]   ;;  %v2286_v32 = vld [vmem:[#allocation2 + $0xe0] ss:$12 sps:$4 sm:$0xff]  }
  0x2f   :  { %v2605_v20 = vrot.slane %v2601_v19, %v2596_v16  ;;  %v2282_v29 = vld [vmem:[#allocation2 + $0x8] ss:$12 sps:$4 sm:$0xff]   ;;  %2109 = vmatprep.subr.bf16.mxu1 %v2281_v28  ;;  %v2287_v33 = vld [vmem:[#allocation2 + $0x20] ss:$12 sps:$4 sm:$0xff]   ;;  %v2291_v36 = vld [vmem:[#allocation2 + $0xf8] ss:$12 sps:$4 sm:$0xff]   ;;  %v2612_v60 = vrot.slane %v268_v54, %v2596_v16 }
  0x30   :  { %1116 = vmatpush1.bf16.msra.mxu0 %v2216_v5  ;;  %v2238_v31 = vld [vmem:[#allocation2 + $0xf4] ss:$12 sps:$4 sm:$0xff]   ;;  %2110 = vmatpush3.bf16.msra.mxu1 %v2282_v29  ;;  %v2241_v35 = vld [vmem:[#allocation2 + $0x10c] ss:$12 sps:$4 sm:$0xff]   ;;  %v2244_v39 = vld [vmem:[#allocation2 + $0x124] ss:$12 sps:$4 sm:$0xff]  }
  0x31   :  { %1117 = vmatprep.subr.bf16.mxu0 %v2217_v6  ;;  %v283_v23 = vcombine.high %v2605_v20, %v2605_v20  ;;  %2111 = vmatprep.subr.bf16.mxu1 %v2286_v32  ;;  %v2292_v37 = vld [vmem:[#allocation2 + $0x38] ss:$12 sps:$4 sm:$0xff]   ;;  %v2243_v38 = vld [vmem:[#allocation2 + $0x108] ss:$12 sps:$4 sm:$0xff]   ;;  %v2296_v40 = vld [vmem:[#allocation2 + $0x110] ss:$12 sps:$4 sm:$0xff]   ;;  %v284_v0 = vcombine.high %v2612_v60, %v2612_v60 }
  0x32   :  { %v2297_v41 = vld [vmem:[#allocation2 + $0x50] ss:$12 sps:$4 sm:$0xff]   ;;  %v2301_v42 = vld [vmem:[#allocation2 + $0x128] ss:$12 sps:$4 sm:$0xff]   ;;  %v2246_v43 = vld [vmem:[#allocation2 + $0x120] ss:$12 sps:$4 sm:$0xff]  }
  0x33   :  { %1143 = vmatprep.mubr.bf16.mxu0 %v283_v23  ;;  %1307 = vmatprep.mubr.bf16.mxu1 %v283_v23  ;;  %v2247_v44 = vld [vmem:[#allocation2 + $0x13c] ss:$12 sps:$4 sm:$0xff]   ;;  %v2306_v46 = vld [vmem:[#allocation2 + $0x140] ss:$12 sps:$4 sm:$0xff]   ;;  %v2249_v47 = vld [vmem:[#allocation2 + $0x138] ss:$12 sps:$4 sm:$0xff]  }
  0x34   :  { %1118 = vmatpush1.bf16.msra.mxu0 %v2219_v10  ;;  %2112 = vmatpush3.bf16.msra.mxu1 %v2287_v33  ;;  %v2302_v45 = vld [vmem:[#allocation2 + $0x68] ss:$12 sps:$4 sm:$0xff]   ;;  %v2307_v49 = vld [vmem:[#allocation2 + $0x80] ss:$12 sps:$4 sm:$0xff]   ;;  %v2311_v50 = vld [vmem:[#allocation2 + $0x158] ss:$12 sps:$4 sm:$0xff]  }
  0x35   :  { %1119 = vmatprep.subr.bf16.mxu0 %v2220_v11  ;;  %2113 = vmatprep.subr.bf16.mxu1 %v2291_v36  ;;  %v2250_v48 = vld [vmem:[#allocation2 + $0x154] ss:$12 sps:$4 sm:$0xff]   ;;  %v2252_v51 = vld [vmem:[#allocation2 + $0x150] ss:$12 sps:$4 sm:$0xff]   ;;  %v2253_v52 = vld [vmem:[#allocation2 + $0x16c] ss:$12 sps:$4 sm:$0xff]  }
  0x36   :  { %v2312_v53 = vld [vmem:[#allocation2 + $0x98] ss:$12 sps:$4 sm:$0xff]   ;;  %v2316_v55 = vld [vmem:[#allocation2 + $0x170] ss:$12 sps:$4 sm:$0xff]   ;;  %v2255_v56 = vld [vmem:[#allocation2 + $0x168] ss:$12 sps:$4 sm:$0xff]  }
  0x37   :  { %v2259_v57 = vld [vmem:[#allocation2 + $0x184] ss:$12 sps:$4 sm:$0xff]   ;;  %v2321_v59 = vld [vmem:[#allocation2 + $0x248] ss:$12 sps:$4 sm:$0xff]   ;;  %v2257_v61 = vld [vmem:[#allocation2 + $0x180] ss:$12 sps:$4 sm:$0xff]  }
  0x38   :  { %1120 = vmatpush1.bf16.msra.mxu0 %v2222_v14  ;;  %2114 = vmatpush3.bf16.msra.mxu1 %v2292_v37  ;;  %v2317_v58 = vld [vmem:[#allocation2 + $0xb0] ss:$12 sps:$4 sm:$0xff]   ;;  %v2322_v63 = vld [vmem:[#allocation2 + $0x188] ss:$12 sps:$4 sm:$0xff]   ;;  %v2326_v1 = vld [vmem:[#allocation2 + $0x260] ss:$12 sps:$4 sm:$0xff]  }
  0x39   :  { %1121 = vmatprep.subr.bf16.mxu0 %v2223_v15  ;;  %2115 = vmatprep.subr.bf16.mxu1 %v2296_v40  ;;  %v2262_v62 = vld [vmem:[#allocation2 + $0x19c] ss:$12 sps:$4 sm:$0xff]   ;;  %v2260_v2 = vld [vmem:[#allocation2 + $0x198] ss:$12 sps:$4 sm:$0xff]   ;;  %v2265_v3 = vld [vmem:[#allocation2 + $0x1b4] ss:$12 sps:$4 sm:$0xff]  }
  0x3a   :  { %v2327_v4 = vld [vmem:[#allocation2 + $0x1a0] ss:$12 sps:$4 sm:$0xff]   ;;  %v2331_v5 = vld [vmem:[#allocation2 + $0x278] ss:$12 sps:$4 sm:$0xff]   ;;  %v2263_v6 = vld [vmem:[#allocation2 + $0x1b0] ss:$12 sps:$4 sm:$0xff]  }
  0x3b   :  { %v2268_v7 = vld [vmem:[#allocation2 + $0x1cc] ss:$12 sps:$4 sm:$0xff]   ;;  %v2336_v9 = vld [vmem:[#allocation2 + $0x290] ss:$12 sps:$4 sm:$0xff]   ;;  %v2266_v10 = vld [vmem:[#allocation2 + $0x1c8] ss:$12 sps:$4 sm:$0xff]  }
  0x3c   :  { %1122 = vmatpush1.bf16.msra.mxu0 %v2225_v17  ;;  %2116 = vmatpush3.bf16.msra.mxu1 %v2297_v41  ;;  %v2332_v8 = vld [vmem:[#allocation2 + $0x1b8] ss:$12 sps:$4 sm:$0xff]   ;;  %v2337_v13 = vld [vmem:[#allocation2 + $0x1d0] ss:$12 sps:$4 sm:$0xff]   ;;  %v2341_v14 = vld [vmem:[#allocation2 + $0x2a8] ss:$12 sps:$4 sm:$0xff]  }
  0x3d   :  { %1123 = vmatprep.subr.bf16.mxu0 %v2226_v18  ;;  %2117 = vmatprep.subr.bf16.mxu1 %v2301_v42  ;;  %v2271_v11 = vld [vmem:[#allocation2 + $0x1e4] ss:$12 sps:$4 sm:$0xff]   ;;  %v2269_v15 = vld [vmem:[#allocation2 + $0x1e0] ss:$12 sps:$4 sm:$0xff]   ;;  %v2274_v17 = vld [vmem:[#allocation2 + $0x1fc] ss:$12 sps:$4 sm:$0xff]  }
  0x3e   :  { %v2342_v18 = vld [vmem:[#allocation2 + $0x1e8] ss:$12 sps:$4 sm:$0xff]   ;;  %v2346_v19 = vld [vmem:[#allocation2 + $0x2c0] ss:$12 sps:$4 sm:$0xff]   ;;  %v2351_v23 = vld [vmem:[#allocation2 + $0x2d8] ss:$12 sps:$4 sm:$0xff]  }
  0x3f   :  { %v2278_v28 = vld [vmem:[#allocation2 + $0x228] ss:$12 sps:$4 sm:$0xff]   ;;  %v2285_v29 = vld [vmem:[#allocation2 + $0x244] ss:$12 sps:$4 sm:$0xff]   ;;  %v2283_v32 = vld [vmem:[#allocation2 + $0x240] ss:$12 sps:$4 sm:$0xff]  }
  0x40   :  { %1124 = vmatpush1.bf16.msra.mxu0 %v2228_v21  ;;  %2118 = vmatpush3.bf16.msra.mxu1 %v2302_v45  ;;  %v2277_v21 = vld [vmem:[#allocation2 + $0x214] ss:$12 sps:$4 sm:$0xff]   ;;  %v2290_v33 = vld [vmem:[#allocation2 + $0x25c] ss:$12 sps:$4 sm:$0xff]   ;;  %v2288_v36 = vld [vmem:[#allocation2 + $0x258] ss:$12 sps:$4 sm:$0xff]  }
  0x41   :  { %1125 = vmatprep.subr.bf16.mxu0 %v2229_v22  ;;  %2119 = vmatprep.subr.bf16.mxu1 %v2306_v46  ;;  %v2347_v22 = vld [vmem:[#allocation2 + $0x200] ss:$12 sps:$4 sm:$0xff]   ;;  %v2293_v40 = vld [vmem:[#allocation2 + $0x270] ss:$12 sps:$4 sm:$0xff]   ;;  %v2372_v42 = vld [vmem:[#allocation2 + $0x338] ss:$12 sps:$4 sm:$0xff]  }
  0x42   :  { %v2295_v37 = vld [vmem:[#allocation2 + $0x274] ss:$12 sps:$4 sm:$0xff]   ;;  %v2300_v41 = vld [vmem:[#allocation2 + $0x28c] ss:$12 sps:$4 sm:$0xff]   ;;  %v2305_v45 = vld [vmem:[#allocation2 + $0x2a4] ss:$12 sps:$4 sm:$0xff]  }
  0x43   :  { %v2377_v46 = vld [vmem:[#allocation2 + $0x350] ss:$12 sps:$4 sm:$0xff]   ;;  %v2308_v54 = vld [vmem:[#allocation2 + $0x2b8] ss:$12 sps:$4 sm:$0xff]   ;;  %vm1438_vm2 = vcmask 1043456   ;;  %vm1886_vm3 = vcmask 1040384  }
  0x44   :  { %1126 = vmatpush1.bf16.msra.mxu0 %v2231_v24  ;;  %2120 = vmatpush3.bf16.msra.mxu1 %v2307_v49  ;;  %v2275_v24 = vld [vmem:[#allocation2 + $0x210] ss:$12 sps:$4 sm:$0xff]   ;;  %vm1889_vm4 = vcmask 1041408  }
  0x45   :  { %1127 = vmatprep.subr.bf16.mxu0 %v2232_v25  ;;  %2121 = vmatprep.subr.bf16.mxu1 %v2311_v50  ;;  %v2280_v25 = vld [vmem:[#allocation2 + $0x22c] ss:$12 sps:$4 sm:$0xff]   ;;  %v2310_v49 = vld [vmem:[#allocation2 + $0x2bc] ss:$12 sps:$4 sm:$0xff]  }
  0x46   :  { %v2382_v50 = vld [vmem:[#allocation2 + $0x368] ss:$12 sps:$4 sm:$0xff]  }
  0x48   :  { %1128 = vmatpush1.bf16.msra.mxu0 %v2234_v26  ;;  %2122 = vmatpush3.bf16.msra.mxu1 %v2312_v53  ;;  %v2352_v26 = vld [vmem:[#allocation2 + $0x218] ss:$12 sps:$4 sm:$0xff]  }
  0x49   :  { %1129 = vmatprep.subr.bf16.mxu0 %v2235_v27  ;;  %2123 = vmatprep.subr.bf16.mxu1 %v2316_v55  ;;  %v2356_v27 = vld [vmem:[#allocation2 + $0x2f0] ss:$12 sps:$4 sm:$0xff]   ;;  %v2315_v55 = vld [vmem:[#allocation2 + $0x2d4] ss:$12 sps:$4 sm:$0xff]  }
  0x4c   :  { %1130 = vmatpush1.bf16.msra.mxu0 %v2237_v30  ;;  %2124 = vmatpush3.bf16.msra.mxu1 %v2317_v58  ;;  %v2357_v30 = vld [vmem:[#allocation2 + $0x230] ss:$12 sps:$4 sm:$0xff]  }
  0x4d   :  { %1131 = vmatprep.subr.bf16.mxu0 %v2238_v31  ;;  %2131 = vmatprep.subr.bf16.mxu1 %v2321_v59  ;;  %v2361_v31 = vld [vmem:[#allocation2 + $0x3c8] ss:$12 sps:$4 sm:$0xff]   ;;  %v2313_v58 = vld [vmem:[#allocation2 + $0x2d0] ss:$12 sps:$4 sm:$0xff]   ;;  %v2391_v59 = vld [vmem:[#allocation2 + $0x458] ss:$12 sps:$4 sm:$0xff]  }
  0x4f   :  { %1308 = vmatmul.mubr.bf16.vlgmr.msra.gmra.mrb[0].mxu1 %v2605_v20 }
  0x50   :  { %1132 = vmatpush1.bf16.msra.mxu0 %v2240_v34  ;;  %2132 = vmatpush3.bf16.msra.mxu1 %v2322_v63  ;;  %v2362_v34 = vld [vmem:[#allocation2 + $0x308] ss:$12 sps:$4 sm:$0xff]   ;;  %v2396_v63 = vld [vmem:[#allocation2 + $0x470] ss:$12 sps:$4 sm:$0xff]  }
  0x51   :  { %1133 = vmatprep.subr.bf16.mxu0 %v2241_v35  ;;  %2133 = vmatprep.subr.bf16.mxu1 %v2326_v1  ;;  %v2366_v35 = vld [vmem:[#allocation2 + $0x3e0] ss:$12 sps:$4 sm:$0xff]   ;;  %v2325_v1 = vld [vmem:[#allocation2 + $0x304] ss:$12 sps:$4 sm:$0xff]  }
  0x52   :  { %1347 = vmatprep.mubr.bf16.mxu1 %v284_v0 }
  0x54   :  { %1134 = vmatpush1.bf16.msra.mxu0 %v2243_v38  ;;  %2134 = vmatpush3.bf16.msra.mxu1 %v2327_v4  ;;  %v2367_v38 = vld [vmem:[#allocation2 + $0x320] ss:$12 sps:$4 sm:$0xff]   ;;  %v2330_v4 = vld [vmem:[#allocation2 + $0x31c] ss:$12 sps:$4 sm:$0xff]  }
  0x55   :  { %1135 = vmatprep.subr.bf16.mxu0 %v2244_v39  ;;  %2135 = vmatprep.subr.bf16.mxu1 %v2331_v5  ;;  %v2371_v39 = vld [vmem:[#allocation2 + $0x3f8] ss:$12 sps:$4 sm:$0xff]   ;;  %v2402_v5 = vld [vmem:[#allocation2 + $0x488] ss:$12 sps:$4 sm:$0xff]  }
  0x58   :  { %1136 = vmatpush1.bf16.msra.mxu0 %v2246_v43  ;;  %2136 = vmatpush3.bf16.msra.mxu1 %v2332_v8  ;;  %v2376_v43 = vld [vmem:[#allocation2 + $0x410] ss:$12 sps:$4 sm:$0xff]   ;;  %v2335_v8 = vld [vmem:[#allocation2 + $0x334] ss:$12 sps:$4 sm:$0xff]  }
  0x59   :  { %1137 = vmatprep.subr.bf16.mxu0 %v2247_v44  ;;  %2137 = vmatprep.subr.bf16.mxu1 %v2336_v9  ;;  %v2298_v44 = vld [vmem:[#allocation2 + $0x288] ss:$12 sps:$4 sm:$0xff]  }
  0x5c   :  { %1138 = vmatpush1.bf16.msra.mxu0 %v2249_v47  ;;  %2138 = vmatpush3.bf16.msra.mxu1 %v2337_v13  ;;  %v2381_v47 = vld [vmem:[#allocation2 + $0x428] ss:$12 sps:$4 sm:$0xff]   ;;  %v2340_v13 = vld [vmem:[#allocation2 + $0x34c] ss:$12 sps:$4 sm:$0xff]  }
  0x5d   :  { %1139 = vmatprep.subr.bf16.mxu0 %v2250_v48  ;;  %2139 = vmatprep.subr.bf16.mxu1 %v2341_v14  ;;  %v2303_v48 = vld [vmem:[#allocation2 + $0x2a0] ss:$12 sps:$4 sm:$0xff]  }
  0x60   :  { %1140 = vmatpush1.bf16.msra.mxu0 %v2252_v51  ;;  %2140 = vmatpush3.bf16.msra.mxu1 %v2342_v18  ;;  %v48_v51 = vld [vmem:[%s2801_s0 + $0x8] sm:$0x3f] }
  0x61   :  { %1141 = vmatprep.subr.bf16.mxu0 %v2253_v52  ;;  %2141 = vmatprep.subr.bf16.mxu1 %v2346_v19  ;;  %v2386_v52 = vld [vmem:[#allocation2 + $0x440] ss:$12 sps:$4 sm:$0xff]   ;;  %v2623_v53 = vrot.slane %v48_v51, %v2596_v16  ;;  %v285_v9 = vcombine.high %v48_v51, %v48_v51  ;;  %v2350_v19 = vld [vmem:[#allocation2 + $0x37c] ss:$12 sps:$4 sm:$0xff]  }
  0x62   :  { %v2343_v18 = vld [vmem:[#allocation2 + $0x360] ss:$12 sps:$4 sm:$0xff]   ;;  %v2419_v51 = vld [vmem:[%s2804_s3 + $0x90] ss:$24 sps:$4 sm:$0xff]  }
  0x63   :  { %v2630_v14 = vrot.slane %v285_v9, %v2596_v16  ;;  %v2355_v16 = vld [vmem:[#allocation2 + $0x394] ss:$12 sps:$4 sm:$0xff]  }
  0x64   :  { %1142 = vmatpush1.bf16.msra.mxu0 %v2255_v56  ;;  %2142 = vmatpush3.bf16.msra.mxu1 %v2347_v22  ;;  %v300_v56 = vcombine.high %v2623_v53, %v2623_v53  ;;  %v2360_v22 = vld [vmem:[#allocation2 + $0x3ac] ss:$12 sps:$4 sm:$0xff]  }
  0x65   :  { %1152 = vmatprep.subr.bf16.mxu0 %v2259_v57  ;;  %2143 = vmatprep.subr.bf16.mxu1 %v2351_v23  ;;  %v2387_v57 = vld [vmem:[#allocation2 + $0x380] ss:$12 sps:$4 sm:$0xff]   ;;  %v2358_v23 = vld [vmem:[#allocation2 + $0x3a8] ss:$12 sps:$4 sm:$0xff]  }
  0x67   :  { %1144 = vmatmul.mubr.bf16.vlgmr.msra.gmra.mrb[0].mxu0 %v2605_v20  ;;  %v2272_v20 = vld [vmem:[#allocation2 + $0x1f8] ss:$12 sps:$4 sm:$0xff]  }
  0x68   :  { %1153 = vmatpush1.bf16.msra.mxu0 %v2257_v61  ;;  %1184 = vmatprep.mubr.bf16.mxu0 %v284_v0  ;;  %v2320_v61 = vld [vmem:[#allocation2 + $0x2ec] ss:$12 sps:$4 sm:$0xff]   ;;  %v2318_v0 = vld [vmem:[#allocation2 + $0x2e8] ss:$12 sps:$4 sm:$0xff]  }
  0x69   :  { %1154 = vmatprep.subr.bf16.mxu0 %v2262_v62  ;;  %2144 = vmatpush3.bf16.msra.mxu1 %v2352_v26  ;;  %v2392_v62 = vld [vmem:[#allocation2 + $0x398] ss:$12 sps:$4 sm:$0xff]   ;;  %v2370_v26 = vld [vmem:[#allocation2 + $0x3dc] ss:$12 sps:$4 sm:$0xff]  }
  0x6a   :  { %2145 = vmatprep.subr.bf16.mxu1 %v2356_v27  ;;  %v2368_v27 = vld [vmem:[#allocation2 + $0x3d8] ss:$12 sps:$4 sm:$0xff]  }
  0x6c   :  { %1155 = vmatpush1.bf16.msra.mxu0 %v2260_v2  ;;  %v2397_v2 = vld [vmem:[#allocation2 + $0x3b0] ss:$12 sps:$4 sm:$0xff]  }
  0x6d   :  { %1156 = vmatprep.subr.bf16.mxu0 %v2265_v3  ;;  %2146 = vmatpush3.bf16.msra.mxu1 %v2357_v30  ;;  %v2323_v3 = vld [vmem:[#allocation2 + $0x300] ss:$12 sps:$4 sm:$0xff]  }
  0x6e   :  { %2153 = vmatprep.subr.bf16.mxu1 %v2361_v31  ;;  %v2380_v30 = vld [vmem:[#allocation2 + $0x40c] ss:$12 sps:$4 sm:$0xff]   ;;  %v2378_v31 = vld [vmem:[#allocation2 + $0x408] ss:$12 sps:$4 sm:$0xff]  }
  0x70   :  { %1157 = vmatpush1.bf16.msra.mxu0 %v2263_v6  ;;  %1348 = vmatmul.mubr.bf16.vlgmr.msra.gmra.mrb[4].mxu1 %v2612_v60  ;;  %v2328_v6 = vld [vmem:[#allocation2 + $0x318] ss:$12 sps:$4 sm:$0xff]  }
  0x71   :  { %1158 = vmatprep.subr.bf16.mxu0 %v2268_v7  ;;  %2154 = vmatpush3.bf16.msra.mxu1 %v2362_v34  ;;  %v2536_v7 = vmov 0.0   ;;  %v2390_v34 = vld [vmem:[#allocation2 + $0x43c] ss:$12 sps:$4 sm:$0xff]  }
  0x72   :  { %2155 = vmatprep.subr.bf16.mxu1 %v2366_v35  ;;  %1387 = vmatprep.mubr.bf16.mxu1 %v300_v56  ;;  %v2388_v35 = vld [vmem:[#allocation2 + $0x438] ss:$12 sps:$4 sm:$0xff]  }
  0x74   :  { %1159 = vmatpush1.bf16.msra.mxu0 %v2266_v10  ;;  %v2406_v10 = vld [vmem:[#allocation2 + $0x4a0] ss:$12 sps:$4 sm:$0xff]  }
  0x75   :  { %1160 = vmatprep.subr.bf16.mxu0 %v2271_v11  ;;  %2156 = vmatpush3.bf16.msra.mxu1 %v2367_v38  ;;  %v2333_v11 = vld [vmem:[#allocation2 + $0x330] ss:$12 sps:$4 sm:$0xff]   ;;  %v2400_v38 = vld [vmem:[#allocation2 + $0x46c] ss:$12 sps:$4 sm:$0xff]  }
  0x76   :  { %2157 = vmatprep.subr.bf16.mxu1 %v2371_v39  ;;  %v2410_v39 = vld [vmem:[%s2804_s3] ss:$24 sps:$4 sm:$0xff]  }
  0x78   :  { %1161 = vmatpush1.bf16.msra.mxu0 %v2269_v15  ;;  %v2345_v15 = vld [vmem:[#allocation2 + $0x364] ss:$12 sps:$4 sm:$0xff]  }
  0x79   :  { %1162 = vmatprep.subr.bf16.mxu0 %v2274_v17  ;;  %2158 = vmatpush3.bf16.msra.mxu1 %v2372_v42  ;;  %v2538_v17 = vmov 0   ;;  %v2405_v42 = vld [vmem:[#allocation2 + $0x484] ss:$12 sps:$4 sm:$0xff]  }
  0x7a   :  { %2159 = vmatprep.subr.bf16.mxu1 %v2376_v43  ;;  %v2403_v43 = vld [vmem:[#allocation2 + $0x480] ss:$12 sps:$4 sm:$0xff]  }
  0x7c   :  { %1163 = vmatpush1.bf16.msra.mxu0 %v2272_v20  ;;  %v2348_v20 = vld [vmem:[#allocation2 + $0x378] ss:$12 sps:$4 sm:$0xff]  }
  0x7d   :  { %1164 = vmatprep.subr.bf16.mxu0 %v2277_v21  ;;  %2160 = vmatpush3.bf16.msra.mxu1 %v2377_v46  ;;  %v2353_v21 = vld [vmem:[#allocation2 + $0x390] ss:$12 sps:$4 sm:$0xff]  }
  0x7e   :  { %2161 = vmatprep.subr.bf16.mxu1 %v2381_v47  ;;  %v2413_v46 = vld [vmem:[%s2804_s3 + $0x30] ss:$24 sps:$4 sm:$0xff]   ;;  %v2415_v47 = vld [vmem:[%s2804_s3 + $0x34] ss:$24 sps:$4 sm:$0xff]  }
  0x80   :  { %1165 = vmatpush1.bf16.msra.mxu0 %v2275_v24  ;;  %v2365_v24 = vld [vmem:[#allocation2 + $0x3c4] ss:$12 sps:$4 sm:$0xff]  }
  0x81   :  { %1166 = vmatprep.subr.bf16.mxu0 %v2280_v25  ;;  %2162 = vmatpush3.bf16.msra.mxu1 %v2382_v50  ;;  %v2363_v25 = vld [vmem:[#allocation2 + $0x3c0] ss:$12 sps:$4 sm:$0xff]  }
  0x82   :  { %2163 = vmatprep.subr.bf16.mxu1 %v2386_v52  ;;  %v2421_v50 = vld [vmem:[%s2804_s3 + $0x94] ss:$24 sps:$4 sm:$0xff]  }
  0x84   :  { %1167 = vmatpush1.bf16.msra.mxu0 %v2278_v28  ;;  %v2375_v28 = vld [vmem:[#allocation2 + $0x3f4] ss:$12 sps:$4 sm:$0xff]  }
  0x85   :  { %1168 = vmatprep.subr.bf16.mxu0 %v2285_v29  ;;  %2164 = vmatpush3.bf16.msra.mxu1 %v2387_v57  ;;  %v2373_v29 = vld [vmem:[#allocation2 + $0x3f0] ss:$12 sps:$4 sm:$0xff]  }
  0x86   :  { %2165 = vmatprep.subr.bf16.mxu1 %v2391_v59  ;;  %v2424_v57 = vld [vmem:[%s2804_s3 + $0xc4] ss:$24 sps:$4 sm:$0xff]   ;;  %v2427_v59 = vld [vmem:[%s2804_s3 + $0xf4] ss:$24 sps:$4 sm:$0xff]  }
  0x88   :  { %1169 = vmatpush1.bf16.msra.mxu0 %v2283_v32  ;;  %v2385_v32 = vld [vmem:[#allocation2 + $0x424] ss:$12 sps:$4 sm:$0xff]  }
  0x89   :  { %1170 = vmatprep.subr.bf16.mxu0 %v2290_v33  ;;  %2166 = vmatpush3.bf16.msra.mxu1 %v2392_v62  ;;  %v2383_v33 = vld [vmem:[#allocation2 + $0x420] ss:$12 sps:$4 sm:$0xff]   ;;  %v2430_v62 = vld [vmem:[%s2804_s3 + $0x124] ss:$24 sps:$4 sm:$0xff]  }
  0x8a   :  { %2167 = vmatprep.subr.bf16.mxu1 %v2396_v63  ;;  %v2428_v63 = vld [vmem:[%s2804_s3 + $0x120] ss:$24 sps:$4 sm:$0xff]  }
  0x8c   :  { %1171 = vmatpush1.bf16.msra.mxu0 %v2288_v36  ;;  %v2395_v36 = vld [vmem:[#allocation2 + $0x454] ss:$12 sps:$4 sm:$0xff]  }
  0x8d   :  { %1172 = vmatprep.subr.bf16.mxu0 %v2295_v37  ;;  %2168 = vmatpush3.bf16.msra.mxu1 %v2397_v2  ;;  %v2393_v37 = vld [vmem:[#allocation2 + $0x450] ss:$12 sps:$4 sm:$0xff]  }
  0x8e   :  { %2178 = vmatprep.subr.bf16.mxu1 %v2536_v7  ;;  %v249_v2 = vld [vmem:[#allocation4] sm:$0x7] }
  0x90   :  { %1173 = vmatpush1.bf16.msra.mxu0 %v2293_v40  ;;  %1388 = vmatmul.mubr.bf16.vlgmr.msra.gmra.mrb[8].mxu1 %v2623_v53  ;;  %v2412_v40 = vld [vmem:[%s2804_s3 + $0x4] ss:$24 sps:$4 sm:$0xff]  }
  0x91   :  { %1174 = vmatprep.subr.bf16.mxu0 %v2300_v41  ;;  %2179 = vmatpush3.bf16.msra.mxu1 %v2402_v5  ;;  %v2398_v41 = vld [vmem:[#allocation2 + $0x468] ss:$12 sps:$4 sm:$0xff]  }
  0x92   :  { %2182 = vmatprep.mubr.msk.bf16.mxu1 %vm2537_vm0, %v2536_v7  ;;  %2180 = vmatprep.subr.bf16.mxu1 %v2536_v7 }
  0x94   :  { %1175 = vmatpush1.bf16.msra.mxu0 %v2298_v44  ;;  %v2409_v44 = vld [vmem:[#allocation2 + $0x49c] ss:$12 sps:$4 sm:$0xff]  }
  0x95   :  { %1176 = vmatprep.subr.bf16.mxu0 %v2305_v45  ;;  %2181 = vmatpush3.bf16.msra.mxu1 %v2406_v10  ;;  %v2407_v45 = vld [vmem:[#allocation2 + $0x498] ss:$12 sps:$4 sm:$0xff]  }
  0x96   :  { %1557 = vmatprep.subr.bf16.mxu1 %v2412_v40 }
  0x98   :  { %1177 = vmatpush1.bf16.msra.mxu0 %v2303_v48  ;;  %2183 = vmatmul.mubr.msk.bf16.vlgmr.msra.gmra.mrb[12].mxu1 %vm1107_vm1, %v2630_v14  ;;  %v2416_v48 = vld [vmem:[%s2804_s3 + $0x60] ss:$24 sps:$4 sm:$0xff]  }
  0x99   :  { %1178 = vmatprep.subr.bf16.mxu0 %v2310_v49  ;;  %1589 = vmatprep.mubr.bf16.mxu1 %v2538_v17  ;;  %v2418_v49 = vld [vmem:[%s2804_s3 + $0x64] ss:$24 sps:$4 sm:$0xff]  }
  0x9a   :  { %1558 = vmatpush1.bf16.msra.mxu1 %v2410_v39 }
  0x9b   :  { %1559 = vmatprep.subr.bf16.mxu1 %v2415_v47  ;;  %v2439_v47 = vld [vmem:[%s2804_s3 + $0x3c] ss:$24 sps:$4 sm:$0xff]  }
  0x9c   :  { %1179 = vmatpush1.bf16.msra.mxu0 %v2308_v54 }
  0x9d   :  { %1180 = vmatprep.subr.bf16.mxu0 %v2315_v55 }
  0x9e   :  { %1560 = vmatpush1.bf16.msra.mxu1 %v2413_v46 }
  0x9f   :  { %1561 = vmatprep.subr.bf16.mxu1 %v2418_v49  ;;  %v2442_v49 = vld [vmem:[%s2804_s3 + $0x6c] ss:$24 sps:$4 sm:$0xff]  }
  0xa0   :  { %1181 = vmatpush1.bf16.msra.mxu0 %v2313_v58  ;;  %v2422_v58 = vld [vmem:[%s2804_s3 + $0xc0] ss:$24 sps:$4 sm:$0xff]  }
  0xa1   :  { %1182 = vmatprep.subr.bf16.mxu0 %v2320_v61  ;;  %v2425_v61 = vld [vmem:[%s2804_s3 + $0xf0] ss:$24 sps:$4 sm:$0xff]  }
  0xa2   :  { %1562 = vmatpush1.bf16.msra.mxu1 %v2416_v48 }
  0xa3   :  { %1563 = vmatprep.subr.bf16.mxu1 %v2421_v50 }
  0xa4   :  { %1183 = vmatpush1.bf16.msra.mxu0 %v2318_v0  ;;  %v261_v0 = vsub.s32 2, %v2593_v12 }
  0xa5   :  { %1193 = vmatprep.subr.bf16.mxu0 %v2325_v1  ;;  %v2433_v1 = vld [vmem:[%s2804_s3 + $0x154] ss:$24 sps:$4 sm:$0xff]  }
  0xa6   :  { %1564 = vmatpush1.bf16.msra.mxu1 %v2419_v51  ;;  %v262_v5 = vrot.slane %v249_v2, %v261_v0  ;;  %v2440_v51 = vld [vmem:[%s2804_s3 + $0x68] ss:$24 sps:$4 sm:$0xff]  }
  0xa7   :  { %1185 = vmatmul.mubr.bf16.vlgmr.msra.gmra.mrb[0].mxu0 %v2612_v60  ;;  %v2338_v60 = vld [vmem:[#allocation2 + $0x348] ss:$12 sps:$4 sm:$0xff]   ;;  %1565 = vmatprep.subr.bf16.mxu1 %v2424_v57 }
  0xa8   :  { %1194 = vmatpush1.bf16.msra.mxu0 %v2323_v3  ;;  %1225 = vmatprep.mubr.bf16.mxu0 %v300_v56  ;;  %v2431_v3 = vld [vmem:[%s2804_s3 + $0x150] ss:$24 sps:$4 sm:$0xff]  }
  0xa9   :  { %1195 = vmatprep.subr.bf16.mxu0 %v2330_v4  ;;  %v2436_v4 = vld [vmem:[%s2804_s3 + $0xc] ss:$24 sps:$4 sm:$0xff]   ;;  %v2446_v57 = vld [vmem:[%s2804_s3 + $0xc8] ss:$24 sps:$4 sm:$0xff]  }
  0xaa   :  { %1566 = vmatpush1.bf16.msra.mxu1 %v2422_v58  ;;  %v2452_v0 = vld [vmem:[%s2804_s3 + $0x128] ss:$24 sps:$4 sm:$0xff]  }
  0xab   :  { %1567 = vmatprep.subr.bf16.mxu1 %v2427_v59  ;;  %v2451_v59 = vld [vmem:[%s2804_s3 + $0xfc] ss:$24 sps:$4 sm:$0xff]  }
  0xac   :  { %1196 = vmatpush1.bf16.msra.mxu0 %v2328_v6 }
  0xad   :  { %1197 = vmatprep.subr.bf16.mxu0 %v2335_v8 }
  0xae   :  { %1568 = vmatpush1.bf16.msra.mxu1 %v2425_v61  ;;  %v2449_v61 = vld [vmem:[%s2804_s3 + $0xf8] ss:$24 sps:$4 sm:$0xff]  }
  0xaf   :  { %1569 = vmatprep.subr.bf16.mxu1 %v2430_v62 }
  0xb0   :  { %1198 = vmatpush1.bf16.msra.mxu0 %v2333_v11 }
  0xb1   :  { %1199 = vmatprep.subr.bf16.mxu0 %v2340_v13 }
  0xb2   :  { %1570 = vmatpush1.bf16.msra.mxu1 %v2428_v63  ;;  %v2454_v63 = vld [vmem:[%s2804_s3 + $0x12c] ss:$24 sps:$4 sm:$0xff]  }
  0xb3   :  { %1571 = vmatprep.subr.bf16.mxu1 %v2433_v1 }
  0xb4   :  { %1200 = vmatpush1.bf16.msra.mxu0 %v2338_v60 }
  0xb5   :  { %1201 = vmatprep.subr.bf16.mxu0 %v2345_v15 }
  0xb6   :  { %1572 = vmatpush1.bf16.msra.mxu1 %v2431_v3  ;;  %v2455_v3 = vld [vmem:[%s2804_s3 + $0x158] ss:$24 sps:$4 sm:$0xff]  }
  0xb7   :  { %1695 = vmatprep.subr.bf16.mxu1 %v2436_v4 }
  0xb8   :  { %1202 = vmatpush1.bf16.msra.mxu0 %v2343_v18 }
  0xb9   :  { %1203 = vmatprep.subr.bf16.mxu0 %v2350_v19 }
  0xbc   :  { %1204 = vmatpush1.bf16.msra.mxu0 %v2348_v20 }
  0xbd   :  { %1205 = vmatprep.subr.bf16.mxu0 %v2355_v16 }
  0xc0   :  { %1206 = vmatpush1.bf16.msra.mxu0 %v2353_v21 }
  0xc1   :  { %1207 = vmatprep.subr.bf16.mxu0 %v2360_v22 }
  0xc4   :  { %1208 = vmatpush1.bf16.msra.mxu0 %v2358_v23 }
  0xc5   :  { %1209 = vmatprep.subr.bf16.mxu0 %v2365_v24 }
  0xc8   :  { %1210 = vmatpush1.bf16.msra.mxu0 %v2363_v25 }
  0xc9   :  { %1211 = vmatprep.subr.bf16.mxu0 %v2370_v26 }
  0xcc   :  { %1212 = vmatpush1.bf16.msra.mxu0 %v2368_v27  ;;  %v253_v27 = vsub.s32 0, %v2593_v12 }
  0xcd   :  { %1213 = vmatprep.subr.bf16.mxu0 %v2375_v28 }
  0xce   :  { %v254_v28 = vrot.slane %v249_v2, %v253_v27 }
  0xd0   :  { %1214 = vmatpush1.bf16.msra.mxu0 %v2373_v29 }
  0xd1   :  { %1215 = vmatprep.subr.bf16.mxu0 %v2380_v30 }
  0xd4   :  { %1216 = vmatpush1.bf16.msra.mxu0 %v2378_v31 }
  0xd5   :  { %1217 = vmatprep.subr.bf16.mxu0 %v2385_v32 }
  0xd8   :  { %1218 = vmatpush1.bf16.msra.mxu0 %v2383_v33 }
  0xd9   :  { %1219 = vmatprep.subr.bf16.mxu0 %v2390_v34 }
  0xdc   :  { %1220 = vmatpush1.bf16.msra.mxu0 %v2388_v35 }
  0xdd   :  { %1221 = vmatprep.subr.bf16.mxu0 %v2395_v36 }
  0xe0   :  { %1222 = vmatpush1.bf16.msra.mxu0 %v2393_v37  ;;  %v257_v37 = vsub.s32 1, %v2593_v12  ;;  %v2437_v12 = vld [vmem:[%s2804_s3 + $0x38] ss:$24 sps:$4 sm:$0xff]  }
  0xe1   :  { %1223 = vmatprep.subr.bf16.mxu0 %v2400_v38 }
  0xe2   :  { %v258_v40 = vrot.slane %v249_v2, %v257_v37  ;;  %v2457_v2 = vld [vmem:[%s2804_s3 + $0x15c] ss:$24 sps:$4 sm:$0xff]  }
  0xe4   :  { %1224 = vmatpush1.bf16.msra.mxu0 %v2398_v41 }
  0xe5   :  { %1234 = vmatprep.subr.bf16.mxu0 %v2405_v42 }
  0xe7   :  { %1226 = vmatmul.mubr.bf16.vlgmr.msra.gmra.mrb[0].mxu0 %v2623_v53 }
  0xe8   :  { %1235 = vmatpush1.bf16.msra.mxu0 %v2403_v43  ;;  %1266 = vmatprep.mubr.bf16.mxu0 %v2538_v17 }
  0xe9   :  { %1236 = vmatprep.subr.bf16.mxu0 %v2409_v44 }
  0xec   :  { %1237 = vmatpush1.bf16.msra.mxu0 %v2407_v45  ;;  %v2434_v45 = vld [vmem:[%s2804_s3 + $0x8] ss:$24 sps:$4 sm:$0xff]  }
  0xf3   :  { %2059 = vmatmul.mubr.msk.bf16.vlgmr.msra.gmra.mrb[0].mxu0 %vm1107_vm1, %v2630_v14 }
 0x122   :  { %v2125_v52 = vpop.f32.mrb[0].mxu1 }
 0x123   :  { %v2126_v53 = vpop.f32.mrb[1].mxu1 }
 0x124   :  { %v2127_v54 = vadd.f32 %v2126_v53, %v2125_v52  ;;  %v2128_v55 = vpop.f32.mrb[2].mxu1  ;;  %v2445_v53 = vld [vmem:[%s2804_s3 + $0x9c] ss:$24 sps:$4 sm:$0xff]  }
 0x125   :  { %v2129_v56 = vpop.f32.mrb[3].mxu1 }
 0x126   :  { %v1310_v6 = vadd.f32 %v2127_v54, %v262_v5  ;;  %v2443_v54 = vld [vmem:[%s2804_s3 + $0x98] ss:$24 sps:$4 sm:$0xff]   ;;  %v2448_v56 = vld [vmem:[%s2804_s3 + $0xcc] ss:$24 sps:$4 sm:$0xff]  }
 0x127   :  { %v2460_v5 = vld [vmem:[%s2804_s3 + $0x14] ss:$24 sps:$4 sm:$0xff]  }
 0x143   :  { %v2147_v7 = vpop.f32.mrb[4].mxu1 }
 0x144   :  { %v2148_v8 = vpop.f32.mrb[5].mxu1 }
 0x145   :  { %v2149_v9 = vadd.f32 %v2148_v8, %v2147_v7  ;;  %v2150_v10 = vpop.f32.mrb[6].mxu1  ;;  %v2463_v8 = vld [vmem:[%s2804_s3 + $0x44] ss:$24 sps:$4 sm:$0xff]  }
 0x146   :  { %v2151_v11 = vpop.f32.mrb[7].mxu1  ;;  %v2466_v10 = vld [vmem:[%s2804_s3 + $0x74] ss:$24 sps:$4 sm:$0xff]  }
 0x147   :  { %v1350_v13 = vadd.f32 %v2149_v9, %v1310_v6  ;;  %v2458_v6 = vld [vmem:[%s2804_s3 + $0x10] ss:$24 sps:$4 sm:$0xff]   ;;  %v2461_v9 = vld [vmem:[%s2804_s3 + $0x40] ss:$24 sps:$4 sm:$0xff]  }
 0x148   :  { %v2464_v11 = vld [vmem:[%s2804_s3 + $0x70] ss:$24 sps:$4 sm:$0xff]  }
 0x163   :  { %v2169_v14 = vpop.f32.mrb[8].mxu1 }
 0x164   :  { %v2170_v60 = vpop.f32.mrb[9].mxu1 }
 0x165   :  { %v2171_v15 = vadd.f32 %v2170_v60, %v2169_v14  ;;  %v2172_v18 = vpop.f32.mrb[10].mxu1  ;;  %v2469_v14 = vld [vmem:[%s2804_s3 + $0xa4] ss:$24 sps:$4 sm:$0xff]  }
 0x166   :  { %v2173_v19 = vpop.f32.mrb[11].mxu1  ;;  %v2470_v18 = vld [vmem:[%s2804_s3 + $0xd0] ss:$24 sps:$4 sm:$0xff]  }
 0x167   :  { %v1390_v20 = vadd.f32 %v2171_v15, %v1350_v13  ;;  %v2472_v15 = vld [vmem:[%s2804_s3 + $0xd4] ss:$24 sps:$4 sm:$0xff]  }
 0x16b   :  { %v1429_v16 = vpop.f32.mrb[12].mxu1 }
 0x16c   :  { %v1430_v21 = vadd.f32 %v1429_v16, %v1390_v20  ;;  %v2184_v22 = vpop.f32.mrb[13].mxu1  ;;  %v2475_v20 = vld [vmem:[%s2804_s3 + $0x104] ss:$24 sps:$4 sm:$0xff]   ;;  %v2473_v16 = vld [vmem:[%s2804_s3 + $0x100] ss:$24 sps:$4 sm:$0xff]  }
 0x16d   :  { %v1432_v23 = vpop.f32.mrb[14].mxu1  ;;  %v2478_v22 = vld [vmem:[%s2804_s3 + $0x134] ss:$24 sps:$4 sm:$0xff]  }
 0x16e   :  { %v1437_v24 = vmax.f32 %v1430_v21, 0.0  ;;  %v2185_v25 = vpop.f32.mrb[15].mxu1  ;;  %v2476_v23 = vld [vmem:[%s2804_s3 + $0x130] ss:$24 sps:$4 sm:$0xff]  }
 0x16f   :  { %v2481_v25 = vld [vmem:[%s2804_s3 + $0x164] ss:$24 sps:$4 sm:$0xff]  }
 0x170   :  { %v2692_v26 = vsel %vm1438_vm2, %v1437_v24, 0.0 }
 0x171   :  { %v1454_v13 = vrot.slane %v2692_v26, 4 }
 0x173   :  { %v1455_v60 = vadd.f32 %v1454_v13, %v2692_v26  ;;  %v2479_v26 = vld [vmem:[%s2804_s3 + $0x160] ss:$24 sps:$4 sm:$0xff]  }
 0x175   :  { %v1456_v19 = vrot.slane %v1455_v60, 2 }
 0x177   :  { %v1457_v21 = vadd.f32 %v1456_v19, %v1455_v60 }
 0x179   :  { %v1458_v24 = vrot.slane %v1457_v21, 1 }
 0x17b   :  { %v1459_v27 = vadd.f32 %v1458_v24, %v1457_v21 }
 0x1c6   :  { %v1268_v29 = vpop.f32.mrb[0].mxu0 }
 0x1c7   :  { %v2186_v30 = vadd.f32 %v1268_v29, %v254_v28  ;;  %v1270_v31 = vpop.f32.mrb[1].mxu0  ;;  %v1736_v28 = vpack.c.bf16 %v1459_v27, %v1459_v27 }
 0x1c8   :  { %v1272_v32 = vpop.f32.mrb[2].mxu0  ;;  %v2187_v43 = vadd.f32 %v1270_v31, %v258_v40 }
 0x1c9   :  { %v1435_v33 = vmax.f32 %v2186_v30, 0.0  ;;  %v1273_v34 = vpop.f32.mrb[3].mxu0 }
 0x1ca   :  { %v1436_v48 = vmax.f32 %v2187_v43, 0.0 }
 0x1cb   :  { %v1439_v35 = vsel %vm1438_vm2, %v1435_v33, 0.0 }
 0x1cc   :  { %v1440_v36 = vrot.slane %v1439_v35, 4  ;;  %v1446_v50 = vsel %vm1438_vm2, %v1436_v48, 0.0 }
 0x1cd   :  { %v1447_v52 = vrot.slane %v1446_v50, 4 }
 0x1ce   :  { %v1441_v38 = vadd.f32 %v1440_v36, %v1439_v35 }
 0x1cf   :  { %v1448_v55 = vadd.f32 %v1447_v52, %v1446_v50 }
 0x1d0   :  { %v1442_v39 = vrot.slane %v1441_v38, 2 }
 0x1d1   :  { %v1449_v58 = vrot.slane %v1448_v55, 2 }
 0x1d2   :  { %v1443_v41 = vadd.f32 %v1442_v39, %v1441_v38 }
 0x1d3   :  { %v1450_v62 = vadd.f32 %v1449_v58, %v1448_v55 }
 0x1d4   :  { %v1444_v42 = vrot.slane %v1443_v41, 1 }
 0x1d5   :  { %v1451_v1 = vrot.slane %v1450_v62, 1 }
 0x1d6   :  { %v1445_v44 = vadd.f32 %v1444_v42, %v1443_v41  ;;  %v1892_v41 = vld [vmem:[%s2805_s4] sm:$0x77] }
 0x1d7   :  { %v1452_v4 = vadd.f32 %v1451_v1, %v1450_v62 }
 0x1d8   :  { %v1460_v46 = vpack.c.bf16 %v1445_v44, %v1445_v44 }
 0x1d9   :  { %v1598_v7 = vpack.c.bf16 %v1452_v4, %v1452_v4 }
 0x1da   :  { %1590 = vmatmul.mubr.bf16.vlgmr.msra.gmra.mrb[16].mxu1 %v1460_v46 }
 0x1db   :  { %1696 = vmatpush1.bf16.msra.mxu1 %v2434_v45  ;;  %1727 = vmatprep.mubr.bf16.mxu1 %v2538_v17  ;;  %v1894_v45 = vcombine.high %v1892_v41, %v1892_v41 }
 0x1dc   :  { %1697 = vmatprep.subr.bf16.mxu1 %v2439_v47 }
 0x1df   :  { %1698 = vmatpush1.bf16.msra.mxu1 %v2437_v12 }
 0x1e0   :  { %1699 = vmatprep.subr.bf16.mxu1 %v2442_v49 }
 0x1e3   :  { %1700 = vmatpush1.bf16.msra.mxu1 %v2440_v51 }
 0x1e4   :  { %1701 = vmatprep.subr.bf16.mxu1 %v2445_v53 }
 0x1e7   :  { %1702 = vmatpush1.bf16.msra.mxu1 %v2443_v54 }
 0x1e8   :  { %1703 = vmatprep.subr.bf16.mxu1 %v2448_v56 }
 0x1eb   :  { %1704 = vmatpush1.bf16.msra.mxu1 %v2446_v57 }
 0x1ec   :  { %1705 = vmatprep.subr.bf16.mxu1 %v2451_v59 }
 0x1ef   :  { %1706 = vmatpush1.bf16.msra.mxu1 %v2449_v61 }
 0x1f0   :  { %1707 = vmatprep.subr.bf16.mxu1 %v2454_v63 }
 0x1f3   :  { %1708 = vmatpush1.bf16.msra.mxu1 %v2452_v0 }
 0x1f4   :  { %1709 = vmatprep.subr.bf16.mxu1 %v2457_v2 }
 0x1f7   :  { %1710 = vmatpush1.bf16.msra.mxu1 %v2455_v3 }
 0x1f8   :  { %1833 = vmatprep.subr.bf16.mxu1 %v2460_v5 }
 0x1fa   :  { %1728 = vmatmul.mubr.bf16.vlgmr.msra.gmra.mrb[20].mxu1 %v1598_v7 }
 0x1fb   :  { %1834 = vmatpush1.bf16.msra.mxu1 %v2458_v6  ;;  %1865 = vmatprep.mubr.bf16.mxu1 %v2538_v17  ;;  %v2467_v17 = vld [vmem:[%s2804_s3 + $0xa0] ss:$24 sps:$4 sm:$0xff]  }
 0x1fc   :  { %1835 = vmatprep.subr.bf16.mxu1 %v2463_v8 }
 0x1ff   :  { %1836 = vmatpush1.bf16.msra.mxu1 %v2461_v9 }
 0x200   :  { %1837 = vmatprep.subr.bf16.mxu1 %v2466_v10 }
 0x203   :  { %1838 = vmatpush1.bf16.msra.mxu1 %v2464_v11 }
 0x204   :  { %1839 = vmatprep.subr.bf16.mxu1 %v2469_v14 }
 0x207   :  { %1840 = vmatpush1.bf16.msra.mxu1 %v2467_v17 }
 0x208   :  { %1841 = vmatprep.subr.bf16.mxu1 %v2472_v15 }
 0x20b   :  { %1842 = vmatpush1.bf16.msra.mxu1 %v2470_v18 }
 0x20c   :  { %1843 = vmatprep.subr.bf16.mxu1 %v2475_v20 }
 0x20f   :  { %1844 = vmatpush1.bf16.msra.mxu1 %v2473_v16 }
 0x210   :  { %1845 = vmatprep.subr.bf16.mxu1 %v2478_v22 }
 0x213   :  { %1846 = vmatpush1.bf16.msra.mxu1 %v2476_v23 }
 0x214   :  { %1847 = vmatprep.subr.bf16.mxu1 %v2481_v25 }
 0x217   :  { %1848 = vmatpush1.bf16.msra.mxu1 %v2479_v26 }
 0x21a   :  { %1866 = vmatmul.mubr.bf16.vlgmr.msra.gmra.mrb[24].mxu1 %v1736_v28 }
 0x2ad   :  { %v1591_v29 = vpop.f32.mrb[16].mxu1 }
 0x2ae   :  { %v1593_v30 = vpop.f32.mrb[17].mxu1 }
 0x2af   :  { %v1595_v31 = vpop.f32.mrb[18].mxu1 }
 0x2b0   :  { %v1596_v32 = vpop.f32.mrb[19].mxu1 }
 0x2cd   :  { %v1729_v33 = vpop.f32.mrb[20].mxu1 }
 0x2ce   :  { %v1876_v34 = vrot.slane %v1729_v33, 7  ;;  %v1731_v35 = vpop.f32.mrb[21].mxu1 }
 0x2cf   :  { %v1877_v36 = vrot.slane %v1731_v35, 7  ;;  %v1733_v37 = vpop.f32.mrb[22].mxu1 }
 0x2d0   :  { %v1887_v38 = vsel %vm1886_vm3, %v1591_v29, %v1876_v34  ;;  %v1734_v39 = vpop.f32.mrb[23].mxu1 }
 0x2d1   :  { %v1888_v40 = vsel %vm1886_vm3, %v1593_v30, %v1877_v36 }
 0x2ed   :  { %v1867_v42 = vpop.f32.mrb[24].mxu1 }
 0x2ee   :  { %v1882_v43 = vrot.slane %v1867_v42, 6  ;;  %v1869_v44 = vpop.f32.mrb[25].mxu1 }
 0x2ef   :  { %v1883_v46 = vrot.slane %v1869_v44, 6  ;;  %v1871_v47 = vpop.f32.mrb[26].mxu1 }
 0x2f0   :  { %v1890_v48 = vsel %vm1889_vm4, %v1887_v38, %v1882_v43  ;;  %v1872_v12 = vpop.f32.mrb[27].mxu1 }
 0x2f1   :  { %v1896_v49 = vadd.f32 %v1892_v41, %v1890_v48  ;;  %v1891_v50 = vsel %vm1889_vm4, %v1888_v40, %v1883_v46 }
 0x2f2   :  { %v1897_v51 = vadd.f32 %v1894_v45, %v1891_v50 }
 0x2f4   :  { %v1900_v52 = vcombine.low %v1896_v49, %v1897_v51 }
 0x2f6   :  { %1902 = vst [vmem:[%s2806_s5] sm:$0x77] %v1900_v52 }
 0x2f7   :  { %1907 = vsyncpa [#allocation3], 1 }
 0x2f8   :  { %1908 = vsyncpa [#allocation5], 1 }

</bundles_post_ra>
